<compile_context>
chip_gen: v5e
topology: v5e:2x2
jax: 0.10.0
libtpu: 0.0.40
codegen_flags: <defaults>
</compile_context>

<pallas_src>
import functools

import jax
import jax.numpy as jnp
from jax import lax
from jax.experimental import pallas as pl
from jax.experimental.pallas import tpu as pltpu

LEAKY_SLOPE = 0.01  # torch.nn.LeakyReLU default
BN_EPS = 1e-5       # torch.nn.BatchNorm1d default


def _round_up(x, m):
    return (x + m - 1) // m * m


# --------------------------------------------------------------------------
# Phase A: per-edge messages  m = relu(x[src] + e)
#   grid = (edge blocks [parallel], node chunks [arbitrary / reduction])
# --------------------------------------------------------------------------
def message_kernel(src_ref, x_ref, e_ref, m_ref, acc_ref, *, n_chunk, e_blk):
    k = pl.program_id(1)   # node-chunk index (reduction, innermost)

    @pl.when(k == 0)
    def _():
        acc_ref[...] = jnp.zeros_like(acc_ref)

    # One-hot gather built in-kernel from the raw int32 indices.  Padded edges
    # carry index n_pad, which matches no column of any chunk -> contribute 0.
    src_ids = src_ref[...]                                         # (E_blk, 1) int32
    col_ids = (lax.broadcasted_iota(jnp.int32, (e_blk, n_chunk), 1)
               + k * n_chunk)
    src_oh = (col_ids == src_ids).astype(jnp.float32)              # (E_blk, n_chunk)
    acc_ref[...] += jnp.dot(src_oh, x_ref[...],
                            preferred_element_type=jnp.float32)    # (E_blk, Din)

    @pl.when(k == pl.num_programs(1) - 1)
    def _():
        # per-edge message m = relu(x_src + e); padded edges have zero features.
        m_ref[...] = jnp.maximum(acc_ref[...] + e_ref[...], 0.0)


# --------------------------------------------------------------------------
# Phase B: scatter-sum to dst + residual + Linear + LeakyReLU + BN (eval affine)
#   grid = (node tiles [parallel], edge blocks [arbitrary / reduction])
# --------------------------------------------------------------------------
def aggregate_kernel(dst_ref, m_ref, x_ref, w_ref, b_ref, scale_ref, shift_ref,
                     o_ref, acc_ref, *, n_tile, e_blk):
    i = pl.program_id(0)   # node-tile index
    k = pl.program_id(1)   # edge-block index (reduction, innermost)

    @pl.when(k == 0)
    def _():
        acc_ref[...] = jnp.zeros_like(acc_ref)

    # scatter-sum: rows of this node tile vs dst indices of this edge block.
    dst_ids = dst_ref[...]                                          # (1, E_blk) int32
    row_ids = (lax.broadcasted_iota(jnp.int32, (n_tile, e_blk), 0)
               + i * n_tile)
    dst_oh_t = (row_ids == dst_ids).astype(jnp.float32)             # (N_tile, E_blk)
    acc_ref[...] += jnp.dot(dst_oh_t, m_ref[...],
                            preferred_element_type=jnp.float32)     # (N_tile, Din)

    # fused epilogue on the resident accumulator (last edge block only)
    @pl.when(k == pl.num_programs(1) - 1)
    def _():
        rst = x_ref[...] + acc_ref[...]                              # (N_tile, Din)
        lin = jnp.dot(rst, w_ref[...],
                      preferred_element_type=jnp.float32) + b_ref[...]
        # TODO(synk): Dropout is identity (eval mode); train-mode dropout would
        # need pltpu.prng_seed / pltpu.prng_random_bits with a per-call seed.
        act = jnp.where(lin >= 0.0, lin, LEAKY_SLOPE * lin)          # LeakyReLU
        o_ref[...] = act * scale_ref[...] + shift_ref[...]           # eval BatchNorm1d


def cigconv_forward(src_idx, dst_idx, node_feat, edge_feat,
                    w, b, bn_gamma, bn_beta, bn_mean, bn_var):
    N, Din = node_feat.shape
    E = edge_feat.shape[0]
    Dout = w.shape[1]
    f32 = jnp.float32

    # ---- tiling plan (all temporaries bounded independent of N / E) --------
    n_tile = 256     # node rows per phase-B tile (full 256-row MXU on v6e/v7x)
    n_chunk = 256    # node columns per phase-A gather-contraction chunk
    e_blk = 512      # edges per block  -> one-hot temps are 512 KiB f32
    n_pad = _round_up(max(N, 1), max(n_tile, n_chunk))
    e_pad = _round_up(max(E, 1), e_blk)
    dout_pad = _round_up(max(Dout, 1), 128)              # lane-dense output

    # ---- padded / packed operands (graph structure = 2*E int32 only) -------
    x_p = jnp.zeros((n_pad, Din), f32).at[:N].set(node_feat.astype(f32))
    e_p = jnp.zeros((e_pad, Din), f32).at[:E].set(edge_feat.astype(f32))
    # padded edges point at node n_pad (never matched) -> contribute zero
    src_p = jnp.full((e_pad, 1), n_pad, jnp.int32).at[:E, 0].set(
        src_idx.astype(jnp.int32))
    dst_p = jnp.full((1, e_pad), n_pad, jnp.int32).at[0, :E].set(
        dst_idx.astype(jnp.int32))

    w_p = jnp.zeros((Din, dout_pad), f32).at[:, :Dout].set(w.astype(f32))
    b_p = jnp.zeros((1, dout_pad), f32).at[0, :Dout].set(b.astype(f32))
    # fold eval-mode batchnorm into a per-feature affine
    scale = bn_gamma / jnp.sqrt(bn_var + BN_EPS)
    shift = bn_beta - bn_mean * scale
    scale_p = jnp.zeros((1, dout_pad), f32).at[0, :Dout].set(scale.astype(f32))
    shift_p = jnp.zeros((1, dout_pad), f32).at[0, :Dout].set(shift.astype(f32))

    n_eblk = e_pad // e_blk
    n_nchunk = n_pad // n_chunk
    n_ntile = n_pad // n_tile

    # =================== Phase A: per-edge messages =========================
    msg_flops = 2 * e_pad * n_pad * Din                       # gather matmul
    msg_bytes = 4 * (e_pad                                    # src indices
                     + n_eblk * n_pad * Din                   # x re-stream per edge block
                     + e_pad * Din                            # edge feats
                     + e_pad * Din)                           # m written
    m = pl.pallas_call(
        functools.partial(message_kernel, n_chunk=n_chunk, e_blk=e_blk),
        out_shape=jax.ShapeDtypeStruct((e_pad, Din), f32),
        grid_spec=pltpu.PrefetchScalarGridSpec(
            num_scalar_prefetch=0,
            grid=(n_eblk, n_nchunk),
            in_specs=[
                pl.BlockSpec((e_blk, 1), lambda i, k: (i, 0)),      # src idx
                pl.BlockSpec((n_chunk, Din), lambda i, k: (k, 0)),  # node-feat chunk
                pl.BlockSpec((e_blk, Din), lambda i, k: (i, 0)),    # edge feats
            ],
            out_specs=pl.BlockSpec((e_blk, Din), lambda i, k: (i, 0)),
            scratch_shapes=[pltpu.VMEM((e_blk, Din), f32)],
        ),
        compiler_params=pltpu.CompilerParams(
            dimension_semantics=("parallel", "arbitrary"),
            vmem_limit_bytes=32 * 1024 * 1024),
        cost_estimate=pl.CostEstimate(flops=msg_flops, transcendentals=0,
                                      bytes_accessed=msg_bytes),
    )(src_p, x_p, e_p)

    # =========== Phase B: scatter-sum + residual + fused MLP ================
    agg_flops = (2 * e_pad * n_pad * Din                # scatter matmul (all tiles)
                 + 2 * n_pad * Din * dout_pad)          # linear
    agg_bytes = 4 * (n_ntile * e_pad * (Din + 1)        # m + dst re-stream per tile
                     + n_pad * Din                      # residual node feats
                     + Din * dout_pad + 3 * dout_pad    # w, b, scale, shift
                     + n_pad * dout_pad)                # output
    out = pl.pallas_call(
        functools.partial(aggregate_kernel, n_tile=n_tile, e_blk=e_blk),
        out_shape=jax.ShapeDtypeStruct((n_pad, dout_pad), f32),
        grid_spec=pltpu.PrefetchScalarGridSpec(
            num_scalar_prefetch=0,
            grid=(n_ntile, n_eblk),
            in_specs=[
                pl.BlockSpec((1, e_blk), lambda i, k: (0, k)),       # dst idx
                pl.BlockSpec((e_blk, Din), lambda i, k: (k, 0)),     # messages
                pl.BlockSpec((n_tile, Din), lambda i, k: (i, 0)),    # node tile (residual)
                pl.BlockSpec((Din, dout_pad), lambda i, k: (0, 0)),  # linear weight
                pl.BlockSpec((1, dout_pad), lambda i, k: (0, 0)),    # linear bias
                pl.BlockSpec((1, dout_pad), lambda i, k: (0, 0)),    # bn scale
                pl.BlockSpec((1, dout_pad), lambda i, k: (0, 0)),    # bn shift
            ],
            out_specs=pl.BlockSpec((n_tile, dout_pad), lambda i, k: (i, 0)),
            scratch_shapes=[pltpu.VMEM((n_tile, Din), f32)],
        ),
        compiler_params=pltpu.CompilerParams(
            dimension_semantics=("parallel", "arbitrary"),
            vmem_limit_bytes=32 * 1024 * 1024),
        cost_estimate=pl.CostEstimate(flops=agg_flops, transcendentals=0,
                                      bytes_accessed=agg_bytes),
    )(dst_p, m, x_p, w_p, b_p, scale_p, shift_p)

    return out[:N, :Dout]


def _reference(src_idx, dst_idx, node_feat, edge_feat,
               w, b, bn_gamma, bn_beta, bn_mean, bn_var):
    m = jnp.maximum(node_feat[src_idx] + edge_feat, 0.0)
    neigh = jnp.zeros_like(node_feat).at[dst_idx].add(m)
    rst = node_feat + neigh
    lin = rst @ w + b
    act = jnp.where(lin >= 0.0, lin, LEAKY_SLOPE * lin)
    scale = bn_gamma / jnp.sqrt(bn_var + BN_EPS)
    return act * scale + (bn_beta - bn_mean * scale)


if __name__ == "__main__":
    key = jax.random.PRNGKey(0)
    N, E, Din, Dout = 16, 64, 32, 32

    ks = jax.random.split(key, 9)
    src_idx = jax.random.randint(ks[0], (E,), 0, N)
    dst_idx = jax.random.randint(ks[1], (E,), 0, N)
    node_feat = jax.random.normal(ks[2], (N, Din), dtype=jnp.float32)
    edge_feat = jax.random.normal(ks[3], (E, Din), dtype=jnp.float32)

    # deterministic parameter init (Linear + BatchNorm1d, eval mode)
    w = jax.random.normal(ks[4], (Din, Dout), dtype=jnp.float32) * (1.0 / jnp.sqrt(Din))
    b = jax.random.normal(ks[5], (Dout,), dtype=jnp.float32) * 0.1
    bn_gamma = 1.0 + 0.1 * jax.random.normal(ks[6], (Dout,), dtype=jnp.float32)
    bn_beta = 0.1 * jax.random.normal(ks[7], (Dout,), dtype=jnp.float32)
    bn_mean = 0.1 * jax.random.normal(ks[8], (Dout,), dtype=jnp.float32)
    bn_var = jnp.ones((Dout,), dtype=jnp.float32)

    out = cigconv_forward(src_idx, dst_idx, node_feat, edge_feat,
                          w, b, bn_gamma, bn_beta, bn_mean, bn_var)
    out = jax.block_until_ready(out)

    ref = _reference(src_idx, dst_idx, node_feat, edge_feat,
                     w, b, bn_gamma, bn_beta, bn_mean, bn_var)
    assert out.shape == (N, Dout)
    assert jnp.allclose(out, ref, atol=1e-4, rtol=1e-4), "mismatch vs JAX reference"

    print("KERNEL_OK")
</pallas_src>

<mosaic_0001>
module attributes {stable_mosaic.version = 11 : i64} {
  func.func @message_kernel(%arg0: i32, %arg1: i32, %arg2: memref<512x1xi32, #tpu.memory_space<vmem>>, %arg3: memref<256x32xf32, #tpu.memory_space<vmem>>, %arg4: memref<512x32xf32, #tpu.memory_space<vmem>>, %arg5: memref<512x32xf32, #tpu.memory_space<vmem>>, %arg6: memref<512x32xf32, #tpu.memory_space<vmem>>) attributes {dimension_semantics = [#tpu.dimension_semantics<parallel>, #tpu.dimension_semantics<arbitrary>], iteration_bounds = array<i64: 1, 1>, scalar_prefetch = 0 : i64, scratch_operands = 1 : i64, tpu.core_type = #tpu.core_type<tc>, window_params = [{transform_indices = @transform_0, window_bounds = array<i64: 512, 1>}, {transform_indices = @transform_1, window_bounds = array<i64: 256, 32>}, {transform_indices = @transform_2, window_bounds = array<i64: 512, 32>}, {transform_indices = @transform_3, window_bounds = array<i64: 512, 32>}]} {
    %c0_i32 = arith.constant 0 : i32
    %0 = arith.cmpi eq, %arg1, %c0_i32 : i32
    %1 = arith.extui %0 : i1 to i32
    %c0_i32_0 = arith.constant 0 : i32
    %2 = arith.cmpi ne, %1, %c0_i32_0 : i32
    scf.if %2 {
      %cst_10 = arith.constant 0.000000e+00 : f32
      %20 = vector.broadcast %cst_10 : f32 to vector<512x32xf32>
      %c0_11 = arith.constant 0 : index
      %c0_12 = arith.constant 0 : index
      %21 = vector.load %arg6[%c0_11, %c0_12] : memref<512x32xf32, #tpu.memory_space<vmem>>, vector<512x32xf32>
      tpu.vector_store %arg6[%c0_11, %c0_12], %20 {strides = array<i32>} : memref<512x32xf32, #tpu.memory_space<vmem>>, vector<512x32xf32>,
    } else {
    }
    %c0 = arith.constant 0 : index
    %c0_1 = arith.constant 0 : index
    %3 = vector.load %arg2[%c0, %c0_1] : memref<512x1xi32, #tpu.memory_space<vmem>>, vector<512x1xi32>
    %4 = tpu.iota {dimensions = array<i32: 1>} : vector<512x256xi32>
    %c256_i32 = arith.constant 256 : i32
    %5 = arith.muli %arg1, %c256_i32 : i32
    %6 = vector.broadcast %5 : i32 to vector<512x256xi32>
    %7 = arith.addi %4, %6 : vector<512x256xi32>
    %8 = vector.broadcast %3 : vector<512x1xi32> to vector<512x256xi32>
    %9 = arith.cmpi eq, %7, %8 : vector<512x256xi32>
    %10 = arith.extui %9 : vector<512x256xi1> to vector<512x256xi32>
    %11 = arith.sitofp %10 : vector<512x256xi32> to vector<512x256xf32>
    %c0_2 = arith.constant 0 : index
    %c0_3 = arith.constant 0 : index
    %12 = vector.load %arg6[%c0_2, %c0_3] : memref<512x32xf32, #tpu.memory_space<vmem>>, vector<512x32xf32>
    %c0_4 = arith.constant 0 : index
    %c0_5 = arith.constant 0 : index
    %13 = vector.load %arg3[%c0_4, %c0_5] : memref<256x32xf32, #tpu.memory_space<vmem>>, vector<256x32xf32>
    %cst = arith.constant dense<0.000000e+00> : vector<512x32xf32>
    %14 = tpu.matmul %11, %13, %cst {dimension_numbers = #tpu.dot_dimension_numbers<[1], [0], [0], [1], [0, 0, 1, 1], [], []>} : vector<512x256xf32>, vector<256x32xf32>, vector<512x32xf32> -> vector<512x32xf32>
    %15 = arith.addf %12, %14 : vector<512x32xf32>
    %c0_6 = arith.constant 0 : index
    %c0_7 = arith.constant 0 : index
    %16 = vector.load %arg6[%c0_6, %c0_7] : memref<512x32xf32, #tpu.memory_space<vmem>>, vector<512x32xf32>
    tpu.vector_store %arg6[%c0_6, %c0_7], %15 {strides = array<i32>} : memref<512x32xf32, #tpu.memory_space<vmem>>, vector<512x32xf32>,
    %c0_i32_8 = arith.constant 0 : i32
    %17 = arith.cmpi eq, %arg1, %c0_i32_8 : i32
    %18 = arith.extui %17 : i1 to i32
    %c0_i32_9 = arith.constant 0 : i32
    %19 = arith.cmpi ne, %18, %c0_i32_9 : i32
    scf.if %19 {
      %c0_10 = arith.constant 0 : index
      %c0_11 = arith.constant 0 : index
      %20 = vector.load %arg6[%c0_10, %c0_11] : memref<512x32xf32, #tpu.memory_space<vmem>>, vector<512x32xf32>
      %c0_12 = arith.constant 0 : index
      %c0_13 = arith.constant 0 : index
      %21 = vector.load %arg4[%c0_12, %c0_13] : memref<512x32xf32, #tpu.memory_space<vmem>>, vector<512x32xf32>
      %22 = arith.addf %20, %21 : vector<512x32xf32>
      %cst_14 = arith.constant 0.000000e+00 : f32
      %23 = vector.broadcast %cst_14 : f32 to vector<512x32xf32>
      %24 = arith.maximumf %22, %23 : vector<512x32xf32>
      %c0_15 = arith.constant 0 : index
      %c0_16 = arith.constant 0 : index
      %25 = vector.load %arg5[%c0_15, %c0_16] : memref<512x32xf32, #tpu.memory_space<vmem>>, vector<512x32xf32>
      tpu.vector_store %arg5[%c0_15, %c0_16], %24 {strides = array<i32>} : memref<512x32xf32, #tpu.memory_space<vmem>>, vector<512x32xf32>,
    } else {
    }
    return
  }
  func.func @transform_0(%arg0: i32, %arg1: i32) -> (i32, i32) {
    %c0_i32 = arith.constant 0 : i32
    %c0_i32_0 = arith.constant 0 : i32
    return %arg0, %c0_i32 : i32, i32
  }
  func.func @transform_1(%arg0: i32, %arg1: i32) -> (i32, i32) {
    %c0_i32 = arith.constant 0 : i32
    %c0_i32_0 = arith.constant 0 : i32
    return %arg1, %c0_i32 : i32, i32
  }
  func.func @transform_2(%arg0: i32, %arg1: i32) -> (i32, i32) {
    %c0_i32 = arith.constant 0 : i32
    %c0_i32_0 = arith.constant 0 : i32
    return %arg0, %c0_i32 : i32, i32
  }
  func.func @transform_3(%arg0: i32, %arg1: i32) -> (i32, i32) {
    %c0_i32 = arith.constant 0 : i32
    %c0_i32_0 = arith.constant 0 : i32
    return %arg0, %c0_i32 : i32, i32
  }
}

</mosaic_0001>

<bundles_post_ra>
// kernel: tpu_custom_call.1
= control target key start
LH: loop header
LB: loop body
LE: loop exit
PB: predicated region body
PF: predicated region fallthrough
CT: control target
= control target key end

     0   :  { %v1994_v0 = vmov 0   ;;  %s3211_s0 = inlined_call_operand.vmem [shape: s32[512,1], index: 0, kind: input, shape index: {}]   ;;  %s3212_s1 = inlined_call_operand.vmem [shape: f32[256,32], index: 1, kind: input, shape index: {}]   ;;  %s3213_s2 = inlined_call_operand.vmem [shape: f32[512,32], index: 2, kind: input, shape index: {}]   ;;  %s3214_s3 = inlined_call_operand.vmem [shape: f32[512,32], index: 3, kind: output, shape index: {}]  }
   0x1   :  { %1993 = vset.pattern.permute.xlu2 %v1994_v0  ;;  %1992 = vset.pattern.permute.xlu1 %v1994_v0  ;;  %v117_v1 = vld [vmem:[%s3211_s0 + $0x110] sm:$0xff]  ;;  %v116_v2 = vld [vmem:[%s3211_s0 + $0x108] sm:$0xff]  ;;  %v115_v3 = vld [vmem:[%s3211_s0 + $0x100] sm:$0xff] }
   0x2   :  { %1991 = vset.pattern.permute.xlu0 %v1994_v0  ;;  %257 = vperm.xlu2 %1993, %v117_v1   ;;  %v85_v4 = vld [vmem:[%s3211_s0 + $0x10] sm:$0xff]  ;;  %v84_v5 = vld [vmem:[%s3211_s0 + $0x8] sm:$0xff]  ;;  %v83_v6 = vld [vmem:[%s3211_s0] sm:$0xff] }
   0x3   :  { %254 = vperm.xlu1 %1992, %v116_v2   ;;  %251 = vperm.xlu0 %1991, %v115_v3   ;;  %v119_v7 = vld [vmem:[%s3211_s0 + $0x120] sm:$0xff]  ;;  %v86_v8 = vld [vmem:[%s3211_s0 + $0x18] sm:$0xff]  ;;  %v88_v10 = vld [vmem:[%s3211_s0 + $0x28] sm:$0xff] }
   0x4   :  { %v118_v9 = vld [vmem:[%s3211_s0 + $0x118] sm:$0xff]  ;;  %v120_v11 = vld [vmem:[%s3211_s0 + $0x128] sm:$0xff]  ;;  %v87_v12 = vld [vmem:[%s3211_s0 + $0x20] sm:$0xff] }
   0x5   :  { %v122_v13 = vld [vmem:[%s3211_s0 + $0x138] sm:$0xff]  ;;  %v89_v14 = vld [vmem:[%s3211_s0 + $0x30] sm:$0xff]  ;;  %v91_v16 = vld [vmem:[%s3211_s0 + $0x40] sm:$0xff] }
   0x6   :  { %v121_v15 = vld [vmem:[%s3211_s0 + $0x130] sm:$0xff]  ;;  %v123_v17 = vld [vmem:[%s3211_s0 + $0x140] sm:$0xff]  ;;  %v90_v18 = vld [vmem:[%s3211_s0 + $0x38] sm:$0xff] }
   0x7   :  { %v125_v19 = vld [vmem:[%s3211_s0 + $0x150] sm:$0xff]  ;;  %v92_v20 = vld [vmem:[%s3211_s0 + $0x48] sm:$0xff]  ;;  %v809_v22 = vld [vmem:[%s3212_s1 + $0x78] sm:$0xff] }
   0x8   :  { %v124_v21 = vld [vmem:[%s3211_s0 + $0x148] sm:$0xff]  ;;  %v825_v23 = vld [vmem:[%s3212_s1 + $0xf8] sm:$0xff]  ;;  %v808_v24 = vld [vmem:[%s3212_s1 + $0x70] sm:$0xff]  ;;  %1956 = vmatpush.msra.mxu2 %v809_v22  ;;  %826 = vmatpush.msra.mxu0 %v809_v22 }
   0x9   :  { %1972 = vmatpush.msra.mxu3 %v825_v23  ;;  %v824_v25 = vld [vmem:[%s3212_s1 + $0xf0] sm:$0xff]  ;;  %1035 = vmatpush.msra.mxu1 %v825_v23  ;;  %v94_v26 = vld [vmem:[%s3211_s0 + $0x58] sm:$0xff]  ;;  %v807_v29 = vld [vmem:[%s3212_s1 + $0x68] sm:$0xff] }
   0xa   :  { %161 = vperm.xlu2 %1993, %v85_v4   ;;  %1957 = vmatpush.msra.mxu2 %v808_v24  ;;  %v126_v27 = vld [vmem:[%s3211_s0 + $0x158] sm:$0xff]  ;;  %v93_v28 = vld [vmem:[%s3211_s0 + $0x50] sm:$0xff]  ;;  %v823_v30 = vld [vmem:[%s3212_s1 + $0xe8] sm:$0xff] }
   0xb   :  { %158 = vperm.xlu1 %1992, %v84_v5   ;;  %155 = vperm.xlu0 %1991, %v83_v6   ;;  %v806_v31 = vld [vmem:[%s3212_s1 + $0x60] sm:$0xff]  ;;  %v805_v33 = vld [vmem:[%s3212_s1 + $0x58] sm:$0xff]  ;;  %v128_v35 = vld [vmem:[%s3211_s0 + $0x168] sm:$0xff] }
   0xc   :  { %1973 = vmatpush.msra.mxu3 %v824_v25  ;;  %827 = vmatpush.msra.mxu0 %v808_v24  ;;  %v822_v32 = vld [vmem:[%s3212_s1 + $0xe0] sm:$0xff]  ;;  %v821_v34 = vld [vmem:[%s3212_s1 + $0xd8] sm:$0xff]  ;;  %v804_v36 = vld [vmem:[%s3212_s1 + $0x50] sm:$0xff] }
   0xd   :  { %1036 = vmatpush.msra.mxu1 %v824_v25  ;;  %1958 = vmatpush.msra.mxu2 %v807_v29  ;;  %v95_v37 = vld [vmem:[%s3211_s0 + $0x60] sm:$0xff]  ;;  %v820_v39 = vld [vmem:[%s3212_s1 + $0xd0] sm:$0xff]  ;;  %v803_v40 = vld [vmem:[%s3212_s1 + $0x48] sm:$0xff] }
   0xe   :  { %1974 = vmatpush.msra.mxu3 %v823_v30  ;;  %828 = vmatpush.msra.mxu0 %v807_v29  ;;  %v127_v38 = vld [vmem:[%s3211_s0 + $0x160] sm:$0xff]  ;;  %v819_v41 = vld [vmem:[%s3212_s1 + $0xc8] sm:$0xff]  ;;  %v801_v44 = vld [vmem:[%s3212_s1 + $0x38] sm:$0xff] }
   0xf   :  { %1037 = vmatpush.msra.mxu1 %v823_v30  ;;  %1959 = vmatpush.msra.mxu2 %v806_v31  ;;  %v802_v42 = vld [vmem:[%s3212_s1 + $0x40] sm:$0xff]  ;;  %v97_v45 = vld [vmem:[%s3211_s0 + $0x70] sm:$0xff]  ;;  %v817_v46 = vld [vmem:[%s3212_s1 + $0xb8] sm:$0xff] }
  0x10   :  { %1975 = vmatpush.msra.mxu3 %v822_v32  ;;  %829 = vmatpush.msra.mxu0 %v806_v31  ;;  %v818_v43 = vld [vmem:[%s3212_s1 + $0xc0] sm:$0xff]  ;;  %v129_v47 = vld [vmem:[%s3211_s0 + $0x170] sm:$0xff]  ;;  %v96_v48 = vld [vmem:[%s3211_s0 + $0x68] sm:$0xff] }
  0x11   :  { %1038 = vmatpush.msra.mxu1 %v822_v32  ;;  %1960 = vmatpush.msra.mxu2 %v805_v33  ;;  %v800_v49 = vld [vmem:[%s3212_s1 + $0x30] sm:$0xff]  ;;  %v799_v51 = vld [vmem:[%s3212_s1 + $0x28] sm:$0xff]  ;;  %v798_v53 = vld [vmem:[%s3212_s1 + $0x20] sm:$0xff] }
  0x12   :  { %263 = vperm.xlu2 %1993, %v119_v7   ;;  %1976 = vmatpush.msra.mxu3 %v821_v34  ;;  %v816_v50 = vld [vmem:[%s3212_s1 + $0xb0] sm:$0xff]  ;;  %v815_v52 = vld [vmem:[%s3212_s1 + $0xa8] sm:$0xff]  ;;  %v814_v54 = vld [vmem:[%s3212_s1 + $0xa0] sm:$0xff] }
  0x13   :  { %164 = vperm.xlu1 %1992, %v86_v8   ;;  %260 = vperm.xlu0 %1991, %v118_v9   ;;  %v131_v55 = vld [vmem:[%s3211_s0 + $0x180] sm:$0xff]  ;;  %v797_v56 = vld [vmem:[%s3212_s1 + $0x18] sm:$0xff]  ;;  %v796_v60 = vld [vmem:[%s3212_s1 + $0x10] sm:$0xff] }
  0x14   :  { %830 = vmatpush.msra.mxu0 %v805_v33  ;;  %1039 = vmatpush.msra.mxu1 %v821_v34  ;;  %v98_v57 = vld [vmem:[%s3211_s0 + $0x78] sm:$0xff]  ;;  %v812_v61 = vld [vmem:[%s3212_s1 + $0x90] sm:$0xff]  ;;  %v795_v62 = vld [vmem:[%s3212_s1 + $0x8] sm:$0xff] }
  0x15   :  { %1961 = vmatpush.msra.mxu2 %v804_v36  ;;  %1977 = vmatpush.msra.mxu3 %v820_v39  ;;  %v130_v58 = vld [vmem:[%s3211_s0 + $0x178] sm:$0xff]  ;;  %v811_v63 = vld [vmem:[%s3212_s1 + $0x88] sm:$0xff]  ;;  %v794_v0 = vld [vmem:[%s3212_s1] sm:$0xff] }
  0x16   :  { %831 = vmatpush.msra.mxu0 %v804_v36  ;;  %1040 = vmatpush.msra.mxu1 %v820_v39  ;;  %v813_v59 = vld [vmem:[%s3212_s1 + $0x98] sm:$0xff]  ;;  %v100_v1 = vld [vmem:[%s3211_s0 + $0x88] sm:$0xff]  ;;  %v810_v2 = vld [vmem:[%s3212_s1 + $0x80] sm:$0xff] }
  0x17   :  { %1962 = vmatpush.msra.mxu2 %v803_v40  ;;  %1978 = vmatpush.msra.mxu3 %v819_v41  ;;  %v132_v3 = vld [vmem:[%s3211_s0 + $0x188] sm:$0xff]  ;;  %v99_v4 = vld [vmem:[%s3211_s0 + $0x80] sm:$0xff]  ;;  %v134_v5 = vld [vmem:[%s3211_s0 + $0x198] sm:$0xff] }
  0x18   :  { %832 = vmatpush.msra.mxu0 %v803_v40  ;;  %1041 = vmatpush.msra.mxu1 %v819_v41  ;;  %v101_v6 = vld [vmem:[%s3211_s0 + $0x90] sm:$0xff]  ;;  %v103_v8 = vld [vmem:[%s3211_s0 + $0xa0] sm:$0xff]  ;;  %v140_v24 = vld [vmem:[%s3211_s0 + $0x1c8] sm:$0xff] }
  0x19   :  { %1963 = vmatpush.msra.mxu2 %v802_v42  ;;  %1979 = vmatpush.msra.mxu3 %v818_v43  ;;  %v133_v7 = vld [vmem:[%s3211_s0 + $0x190] sm:$0xff]  ;;  %v135_v9 = vld [vmem:[%s3211_s0 + $0x1a0] sm:$0xff]  ;;  %v108_v31 = vld [vmem:[%s3211_s0 + $0xc8] sm:$0xff] }
  0x1a   :  { %170 = vperm.xlu2 %1993, %v88_v10   ;;  %833 = vmatpush.msra.mxu0 %v802_v42  ;;  %v102_v10 = vld [vmem:[%s3211_s0 + $0x98] sm:$0xff]  ;;  %v107_v25 = vld [vmem:[%s3211_s0 + $0xc0] sm:$0xff]  ;;  %v109_v29 = vld [vmem:[%s3211_s0 + $0xd0] sm:$0xff] }
  0x1b   :  { %266 = vperm.xlu1 %1992, %v120_v11   ;;  %167 = vperm.xlu0 %1991, %v87_v12   ;;  %v147_v11 = vlaneseq  ;;  %v141_v30 = vld [vmem:[%s3211_s0 + $0x1d0] sm:$0xff]  ;;  %v143_v34 = vld [vmem:[%s3211_s0 + $0x1e0] sm:$0xff]  ;;  %v142_v36 = vld [vmem:[%s3211_s0 + $0x1d8] sm:$0xff] }
  0x1c   :  { %1964 = vmatpush.msra.mxu2 %v801_v44  ;;  %1042 = vmatpush.msra.mxu1 %v818_v43  ;;  %v112_v39 = vld [vmem:[%s3211_s0 + $0xe8] sm:$0xff]  ;;  %v111_v41 = vld [vmem:[%s3211_s0 + $0xe0] sm:$0xff] }
  0x1d   :  { %1980 = vmatpush.msra.mxu3 %v817_v46  ;;  %834 = vmatpush.msra.mxu0 %v801_v44  ;;  %v2239_v12 = vand.u32 127, %v147_v11  ;;  %v144_v40 = vld [vmem:[%s3211_s0 + $0x1e8] sm:$0xff]  ;;  %v146_v44 = vld [vmem:[%s3211_s0 + $0x1f8] sm:$0xff] }
  0x1e   :  { %1965 = vmatpush.msra.mxu2 %v800_v49  ;;  %1043 = vmatpush.msra.mxu1 %v817_v46  ;;  %v145_v46 = vld [vmem:[%s3211_s0 + $0x1f0] sm:$0xff] }
  0x1f   :  { %1981 = vmatpush.msra.mxu3 %v816_v50  ;;  %835 = vmatpush.msra.mxu0 %v800_v49  ;;  %v114_v49 = vld [vmem:[%s3211_s0 + $0xf8] sm:$0xff] }
  0x20   :  { %1966 = vmatpush.msra.mxu2 %v799_v51  ;;  %1044 = vmatpush.msra.mxu1 %v816_v50 }
  0x21   :  { %1982 = vmatpush.msra.mxu3 %v815_v52  ;;  %836 = vmatpush.msra.mxu0 %v799_v51 }
  0x22   :  { %272 = vperm.xlu2 %1993, %v122_v13   ;;  %1967 = vmatpush.msra.mxu2 %v798_v53  ;;  %v137_v13 = vld [vmem:[%s3211_s0 + $0x1b0] sm:$0xff] }
  0x23   :  { %173 = vperm.xlu1 %1992, %v89_v14   ;;  %269 = vperm.xlu0 %1991, %v121_v15   ;;  %v104_v14 = vld [vmem:[%s3211_s0 + $0xa8] sm:$0xff] }
  0x24   :  { %1983 = vmatpush.msra.mxu3 %v814_v54  ;;  %1045 = vmatpush.msra.mxu1 %v815_v52  ;;  %v136_v15 = vld [vmem:[%s3211_s0 + $0x1a8] sm:$0xff] }
  0x25   :  { %1968 = vmatpush.msra.mxu2 %v797_v56  ;;  %837 = vmatpush.msra.mxu0 %v798_v53 }
  0x26   :  { %1984 = vmatpush.msra.mxu3 %v813_v59  ;;  %1046 = vmatpush.msra.mxu1 %v814_v54 }
  0x27   :  { %1969 = vmatpush.msra.mxu2 %v796_v60  ;;  %838 = vmatpush.msra.mxu0 %v797_v56 }
  0x28   :  { %1985 = vmatpush.msra.mxu3 %v812_v61  ;;  %1047 = vmatpush.msra.mxu1 %v813_v59 }
  0x29   :  { %1970 = vmatpush.msra.mxu2 %v795_v62  ;;  %839 = vmatpush.msra.mxu0 %v796_v60 }
  0x2a   :  { %179 = vperm.xlu2 %1993, %v91_v16   ;;  %1986 = vmatpush.msra.mxu3 %v811_v63  ;;  %v2251_v16 = vadd.s32 128, %v2239_v12 }
  0x2b   :  { %275 = vperm.xlu1 %1992, %v123_v17   ;;  %176 = vperm.xlu0 %1991, %v90_v18   ;;  %v1995_v18 = vmov 1.0  }
  0x2c   :  { %1971 = vmatpush.msra.mxu2 %v794_v0  ;;  %1048 = vmatpush.msra.mxu1 %v812_v61 }
  0x2d   :  { %1987 = vmatpush.msra.mxu3 %v810_v2  ;;  %840 = vmatpush.msra.mxu0 %v795_v62  ;;  %v1996_v62 = vmov 0.0  }
  0x2e   :  { %1049 = vmatpush.msra.mxu1 %v811_v63 }
  0x2f   :  { %841 = vmatpush.msra.mxu0 %v794_v0 }
  0x30   :  { %1050 = vmatpush.msra.mxu1 %v810_v2 }
  0x32   :  { %281 = vperm.xlu2 %1993, %v125_v19   ;;  %v106_v19 = vld [vmem:[%s3211_s0 + $0xb8] sm:$0xff] }
  0x33   :  { %182 = vperm.xlu1 %1992, %v92_v20   ;;  %278 = vperm.xlu0 %1991, %v124_v21   ;;  %v138_v20 = vld [vmem:[%s3211_s0 + $0x1b8] sm:$0xff]  ;;  %v105_v21 = vld [vmem:[%s3211_s0 + $0xb0] sm:$0xff] }
  0x3a   :  { %188 = vperm.xlu2 %1993, %v94_v26   ;;  %v139_v26 = vld [vmem:[%s3211_s0 + $0x1c0] sm:$0xff] }
  0x3b   :  { %284 = vperm.xlu1 %1992, %v126_v27   ;;  %185 = vperm.xlu0 %1991, %v93_v28  }
  0x42   :  { %290 = vperm.xlu2 %1993, %v128_v35   ;;  %v110_v35 = vld [vmem:[%s3211_s0 + $0xd8] sm:$0xff] }
  0x43   :  { %191 = vperm.xlu1 %1992, %v95_v37   ;;  %287 = vperm.xlu0 %1991, %v127_v38  }
  0x4a   :  { %197 = vperm.xlu2 %1993, %v97_v45   ;;  %v113_v45 = vld [vmem:[%s3211_s0 + $0xf0] sm:$0xff] }
  0x4b   :  { %293 = vperm.xlu1 %1992, %v129_v47   ;;  %194 = vperm.xlu0 %1991, %v96_v48  }
  0x52   :  { %299 = vperm.xlu2 %1993, %v131_v55  }
  0x53   :  { %200 = vperm.xlu1 %1992, %v98_v57   ;;  %296 = vperm.xlu0 %1991, %v130_v58  }
  0x5a   :  { %206 = vperm.xlu2 %1993, %v100_v1  }
  0x5b   :  { %302 = vperm.xlu1 %1992, %v132_v3   ;;  %203 = vperm.xlu0 %1991, %v99_v4  }
  0x5c   :  { %v258_v27 = vpop.permute.xlu2 %257 }
  0x5d   :  { %vm414_vm6 = vcmp.eq.s32.totalorder %v2239_v12, %v258_v27  ;;  %vm415_vm7 = vcmp.eq.s32.totalorder %v2251_v16, %v258_v27 }
  0x62   :  { %308 = vperm.xlu2 %1993, %v134_v5  }
  0x63   :  { %209 = vperm.xlu1 %1992, %v101_v6   ;;  %305 = vperm.xlu0 %1991, %v133_v7  }
  0x64   :  { %v162_v32 = vpop.permute.xlu2 %161 }
  0x65   :  { %vm350_vm10 = vcmp.eq.s32.totalorder %v2239_v12, %v162_v32  ;;  %vm351_vm12 = vcmp.eq.s32.totalorder %v2251_v16, %v162_v32 }
  0x6a   :  { %215 = vperm.xlu2 %1993, %v103_v8  }
  0x6b   :  { %311 = vperm.xlu1 %1992, %v135_v9   ;;  %212 = vperm.xlu0 %1991, %v102_v10  }
  0x6c   :  { %v264_v38 = vpop.permute.xlu2 %263 }
  0x6d   :  { %vm418_vm15 = vcmp.eq.s32.totalorder %v2239_v12, %v264_v38 }
  0x72   :  { %317 = vperm.xlu2 %1993, %v137_v13  }
  0x73   :  { %218 = vperm.xlu1 %1992, %v104_v14   ;;  %314 = vperm.xlu0 %1991, %v136_v15  }
  0x74   :  { %v171_v47 = vpop.permute.xlu2 %170 }
  0x75   :  { %v252_v17 = vpop.permute.xlu0 %251  ;;  %v255_v22 = vpop.permute.xlu1 %254 }
  0x76   :  { %vm410_vm0 = vcmp.eq.s32.totalorder %v2239_v12, %v252_v17  ;;  %vm411_vm1 = vcmp.eq.s32.totalorder %v2251_v16, %v252_v17  ;;  %vm412_vm2 = vcmp.eq.s32.totalorder %v2239_v12, %v255_v22  ;;  %vm413_vm3 = vcmp.eq.s32.totalorder %v2251_v16, %v255_v22 }
  0x77   :  { %1860 = vmatmul.msk.f32.vlgmr.msra.gmra.mxu2 %vm410_vm0, %v1995_v18  ;;  %1924 = vmatmul.msk.f32.vlgmr.msra.gmra.mxu3 %vm411_vm1, %v1995_v18  ;;  %vm419_vm1 = vcmp.eq.s32.totalorder %v2251_v16, %v264_v38 }
  0x7a   :  { %224 = vperm.xlu2 %1993, %v106_v19  }
  0x7b   :  { %320 = vperm.xlu1 %1992, %v138_v20   ;;  %221 = vperm.xlu0 %1991, %v105_v21  }
  0x7c   :  { %v273_v51 = vpop.permute.xlu2 %272 }
  0x7d   :  { %v156_v23 = vpop.permute.xlu0 %155  ;;  %v159_v28 = vpop.permute.xlu1 %158 }
  0x7e   :  { %vm346_vm4 = vcmp.eq.s32.totalorder %v2239_v12, %v156_v23  ;;  %vm347_vm5 = vcmp.eq.s32.totalorder %v2251_v16, %v156_v23  ;;  %vm348_vm8 = vcmp.eq.s32.totalorder %v2239_v12, %v159_v28  ;;  %vm349_vm9 = vcmp.eq.s32.totalorder %v2251_v16, %v159_v28  ;;  %v1472_v23 = vld [vmem:[%s3213_s2 + $0x100] sm:$0xff] }
  0x7f   :  { %1828 = vmatmul.msk.f32.vlgmr.msra.gmra.mxu0 %vm346_vm4, %v1995_v18  ;;  %1861 = vmatmul.msk.f32.gmra.mxu2 %vm412_vm2, %v1995_v18 }
  0x80   :  { %1892 = vmatmul.msk.f32.vlgmr.msra.gmra.mxu1 %vm347_vm5, %v1995_v18  ;;  %1925 = vmatmul.msk.f32.gmra.mxu3 %vm413_vm3, %v1995_v18 }
  0x82   :  { %326 = vperm.xlu2 %1993, %v140_v24  }
  0x83   :  { %227 = vperm.xlu1 %1992, %v107_v25   ;;  %323 = vperm.xlu0 %1991, %v139_v26  }
  0x84   :  { %v180_v54 = vpop.permute.xlu2 %179 }
  0x85   :  { %v261_v33 = vpop.permute.xlu0 %260  ;;  %v165_v37 = vpop.permute.xlu1 %164 }
  0x86   :  { %vm416_vm11 = vcmp.eq.s32.totalorder %v2239_v12, %v261_v33  ;;  %vm417_vm13 = vcmp.eq.s32.totalorder %v2251_v16, %v261_v33  ;;  %vm352_vm14 = vcmp.eq.s32.totalorder %v2239_v12, %v165_v37  ;;  %vm353_vm0 = vcmp.eq.s32.totalorder %v2251_v16, %v165_v37 }
  0x87   :  { %1829 = vmatmul.msk.f32.gmra.mxu0 %vm348_vm8, %v1995_v18  ;;  %1862 = vmatmul.msk.f32.gmra.mxu2 %vm414_vm6, %v1995_v18  ;;  %vm356_vm6 = vcmp.eq.s32.totalorder %v2239_v12, %v171_v47  ;;  %vm357_vm8 = vcmp.eq.s32.totalorder %v2251_v16, %v171_v47 }
  0x88   :  { %1893 = vmatmul.msk.f32.gmra.mxu1 %vm349_vm9, %v1995_v18  ;;  %1926 = vmatmul.msk.f32.gmra.mxu3 %vm415_vm7, %v1995_v18 }
  0x8a   :  { %233 = vperm.xlu2 %1993, %v109_v29  }
  0x8b   :  { %329 = vperm.xlu1 %1992, %v141_v30   ;;  %230 = vperm.xlu0 %1991, %v108_v31  }
  0x8c   :  { %v282_v57 = vpop.permute.xlu2 %281 }
  0x8d   :  { %v168_v42 = vpop.permute.xlu0 %167  ;;  %v267_v43 = vpop.permute.xlu1 %266 }
  0x8e   :  { %vm354_vm2 = vcmp.eq.s32.totalorder %v2239_v12, %v168_v42  ;;  %vm420_vm3 = vcmp.eq.s32.totalorder %v2239_v12, %v267_v43  ;;  %vm355_vm4 = vcmp.eq.s32.totalorder %v2251_v16, %v168_v42  ;;  %vm421_vm5 = vcmp.eq.s32.totalorder %v2251_v16, %v267_v43 }
  0x8f   :  { %1830 = vmatmul.msk.f32.gmra.mxu0 %vm350_vm10, %v1995_v18  ;;  %1863 = vmatmul.msk.f32.gmra.mxu2 %vm416_vm11, %v1995_v18  ;;  %vm424_vm11 = vcmp.eq.s32.totalorder %v2239_v12, %v273_v51 }
  0x90   :  { %1894 = vmatmul.msk.f32.gmra.mxu1 %vm351_vm12, %v1995_v18  ;;  %1927 = vmatmul.msk.f32.gmra.mxu3 %vm417_vm13, %v1995_v18  ;;  %vm425_vm13 = vcmp.eq.s32.totalorder %v2251_v16, %v273_v51 }
  0x92   :  { %335 = vperm.xlu2 %1993, %v143_v34  }
  0x93   :  { %236 = vperm.xlu1 %1992, %v110_v35   ;;  %332 = vperm.xlu0 %1991, %v142_v36  }
  0x94   :  { %v189_v60 = vpop.permute.xlu2 %188 }
  0x95   :  { %v270_v48 = vpop.permute.xlu0 %269  ;;  %v174_v50 = vpop.permute.xlu1 %173 }
  0x96   :  { %vm422_vm7 = vcmp.eq.s32.totalorder %v2239_v12, %v270_v48  ;;  %vm423_vm9 = vcmp.eq.s32.totalorder %v2251_v16, %v270_v48  ;;  %vm358_vm10 = vcmp.eq.s32.totalorder %v2239_v12, %v174_v50  ;;  %vm359_vm12 = vcmp.eq.s32.totalorder %v2251_v16, %v174_v50 }
  0x97   :  { %1831 = vmatmul.msk.f32.gmra.mxu0 %vm352_vm14, %v1995_v18  ;;  %1864 = vmatmul.msk.f32.gmra.mxu2 %vm418_vm15, %v1995_v18 }
  0x98   :  { %1895 = vmatmul.msk.f32.gmra.mxu1 %vm353_vm0, %v1995_v18  ;;  %1928 = vmatmul.msk.f32.gmra.mxu3 %vm419_vm1, %v1995_v18 }
  0x9a   :  { %242 = vperm.xlu2 %1993, %v112_v39  }
  0x9b   :  { %338 = vperm.xlu1 %1992, %v144_v40   ;;  %239 = vperm.xlu0 %1991, %v111_v41  }
  0x9c   :  { %v291_v0 = vpop.permute.xlu2 %290 }
  0x9d   :  { %v177_v52 = vpop.permute.xlu0 %176  ;;  %v276_v53 = vpop.permute.xlu1 %275 }
  0x9e   :  { %vm360_vm14 = vcmp.eq.s32.totalorder %v2239_v12, %v177_v52  ;;  %vm426_vm15 = vcmp.eq.s32.totalorder %v2239_v12, %v276_v53  ;;  %vm361_vm0 = vcmp.eq.s32.totalorder %v2251_v16, %v177_v52  ;;  %vm427_vm1 = vcmp.eq.s32.totalorder %v2251_v16, %v276_v53 }
  0x9f   :  { %1832 = vmatmul.msk.f32.gmra.mxu0 %vm354_vm2, %v1995_v18  ;;  %1865 = vmatmul.msk.f32.gmra.mxu2 %vm420_vm3, %v1995_v18  ;;  %vm362_vm2 = vcmp.eq.s32.totalorder %v2239_v12, %v180_v54 }
  0xa0   :  { %1896 = vmatmul.msk.f32.gmra.mxu1 %vm355_vm4, %v1995_v18  ;;  %1929 = vmatmul.msk.f32.gmra.mxu3 %vm421_vm5, %v1995_v18  ;;  %vm363_vm4 = vcmp.eq.s32.totalorder %v2251_v16, %v180_v54 }
  0xa2   :  { %344 = vperm.xlu2 %1993, %v146_v44  }
  0xa3   :  { %245 = vperm.xlu1 %1992, %v113_v45   ;;  %341 = vperm.xlu0 %1991, %v145_v46  }
  0xa4   :  { %v198_v3 = vpop.permute.xlu2 %197 }
  0xa5   :  { %v279_v55 = vpop.permute.xlu0 %278  ;;  %v183_v56 = vpop.permute.xlu1 %182 }
  0xa6   :  { %vm428_vm3 = vcmp.eq.s32.totalorder %v2239_v12, %v279_v55  ;;  %vm429_vm5 = vcmp.eq.s32.totalorder %v2251_v16, %v279_v55 }
  0xa7   :  { %1833 = vmatmul.msk.f32.gmra.mxu0 %vm356_vm6, %v1995_v18  ;;  %1866 = vmatmul.msk.f32.gmra.mxu2 %vm422_vm7, %v1995_v18  ;;  %vm364_vm6 = vcmp.eq.s32.totalorder %v2239_v12, %v183_v56  ;;  %vm430_vm7 = vcmp.eq.s32.totalorder %v2239_v12, %v282_v57 }
  0xa8   :  { %1897 = vmatmul.msk.f32.gmra.mxu1 %vm357_vm8, %v1995_v18  ;;  %1930 = vmatmul.msk.f32.gmra.mxu3 %vm423_vm9, %v1995_v18  ;;  %vm365_vm8 = vcmp.eq.s32.totalorder %v2251_v16, %v183_v56  ;;  %vm431_vm9 = vcmp.eq.s32.totalorder %v2251_v16, %v282_v57 }
  0xab   :  { %248 = vperm.xlu0 %1991, %v114_v49  }
  0xac   :  { %v300_v6 = vpop.permute.xlu2 %299 }
  0xad   :  { %v186_v58 = vpop.permute.xlu0 %185  ;;  %v285_v59 = vpop.permute.xlu1 %284 }
  0xaf   :  { %1834 = vmatmul.msk.f32.gmra.mxu0 %vm358_vm10, %v1995_v18  ;;  %1867 = vmatmul.msk.f32.gmra.mxu2 %vm424_vm11, %v1995_v18  ;;  %vm366_vm10 = vcmp.eq.s32.totalorder %v2239_v12, %v186_v58  ;;  %vm432_vm11 = vcmp.eq.s32.totalorder %v2239_v12, %v285_v59 }
  0xb0   :  { %1898 = vmatmul.msk.f32.gmra.mxu1 %vm359_vm12, %v1995_v18  ;;  %1931 = vmatmul.msk.f32.gmra.mxu3 %vm425_vm13, %v1995_v18  ;;  %vm367_vm12 = vcmp.eq.s32.totalorder %v2251_v16, %v186_v58  ;;  %vm433_vm13 = vcmp.eq.s32.totalorder %v2251_v16, %v285_v59 }
  0xb4   :  { %v207_v19 = vpop.permute.xlu2 %206 }
  0xb5   :  { %v288_v61 = vpop.permute.xlu0 %287  ;;  %v192_v63 = vpop.permute.xlu1 %191 }
  0xb7   :  { %1835 = vmatmul.msk.f32.gmra.mxu0 %vm360_vm14, %v1995_v18  ;;  %1868 = vmatmul.msk.f32.gmra.mxu2 %vm426_vm15, %v1995_v18  ;;  %vm18_vm14 = vcmask 261120   ;;  %vm368_vm15 = vcmp.eq.s32.totalorder %v2239_v12, %v189_v60 }
  0xb8   :  { %1899 = vmatmul.msk.f32.gmra.mxu1 %vm361_vm0, %v1995_v18  ;;  %1932 = vmatmul.msk.f32.gmra.mxu3 %vm427_vm1, %v1995_v18  ;;  %vm434_vm0 = vcmp.eq.s32.totalorder %v2239_v12, %v288_v61  ;;  %51 = vst.msk [vmem:[#allocation2 + $0x100] sm:$0xff] %vm18_vm14, %v1996_v62  ;;  %vm369_vm1 = vcmp.eq.s32.totalorder %v2251_v16, %v189_v60 }
  0xb9   :  { %19 = vst.msk [vmem:[#allocation2] sm:$0xff] %vm18_vm14, %v1996_v62 }
  0xba   :  { %20 = vst.msk [vmem:[#allocation2 + $0x8] sm:$0xff] %vm18_vm14, %v1996_v62 }
  0xbb   :  { %21 = vst.msk [vmem:[#allocation2 + $0x10] sm:$0xff] %vm18_vm14, %v1996_v62 }
  0xbc   :  { %22 = vst.msk [vmem:[#allocation2 + $0x18] sm:$0xff] %vm18_vm14, %v1996_v62  ;;  %v309_v31 = vpop.permute.xlu2 %308 }
  0xbd   :  { %23 = vst.msk [vmem:[#allocation2 + $0x20] sm:$0xff] %vm18_vm14, %v1996_v62  ;;  %v195_v1 = vpop.permute.xlu0 %194  ;;  %v294_v2 = vpop.permute.xlu1 %293 }
  0xbe   :  { %24 = vst.msk [vmem:[#allocation2 + $0x28] sm:$0xff] %vm18_vm14, %v1996_v62 }
  0xbf   :  { %1836 = vmatmul.msk.f32.gmra.mxu0 %vm362_vm2, %v1995_v18  ;;  %1869 = vmatmul.msk.f32.gmra.mxu2 %vm428_vm3, %v1995_v18  ;;  %vm435_vm2 = vcmp.eq.s32.totalorder %v2251_v16, %v288_v61  ;;  %25 = vst.msk [vmem:[#allocation2 + $0x30] sm:$0xff] %vm18_vm14, %v1996_v62  ;;  %vm370_vm3 = vcmp.eq.s32.totalorder %v2239_v12, %v192_v63  ;;  %v762_v9 = vld [vmem:[#allocation2 + $0x100] sm:$0xff] }
  0xc0   :  { %1900 = vmatmul.msk.f32.gmra.mxu1 %vm363_vm4, %v1995_v18  ;;  %1933 = vmatmul.msk.f32.gmra.mxu3 %vm429_vm5, %v1995_v18  ;;  %vm436_vm4 = vcmp.eq.s32.totalorder %v2239_v12, %v291_v0  ;;  %26 = vst.msk [vmem:[#allocation2 + $0x38] sm:$0xff] %vm18_vm14, %v1996_v62  ;;  %vm371_vm5 = vcmp.eq.s32.totalorder %v2251_v16, %v192_v63  ;;  %v730_v37 = vld [vmem:[#allocation2] sm:$0xff] }
  0xc1   :  { %27 = vst.msk [vmem:[#allocation2 + $0x40] sm:$0xff] %vm18_vm14, %v1996_v62  ;;  %v731_v43 = vld [vmem:[#allocation2 + $0x8] sm:$0xff] }
  0xc2   :  { %28 = vst.msk [vmem:[#allocation2 + $0x48] sm:$0xff] %vm18_vm14, %v1996_v62  ;;  %v732_v51 = vld [vmem:[#allocation2 + $0x10] sm:$0xff] }
  0xc3   :  { %29 = vst.msk [vmem:[#allocation2 + $0x50] sm:$0xff] %vm18_vm14, %v1996_v62  ;;  %v733_v58 = vld [vmem:[#allocation2 + $0x18] sm:$0xff] }
  0xc4   :  { %30 = vst.msk [vmem:[#allocation2 + $0x58] sm:$0xff] %vm18_vm14, %v1996_v62  ;;  %v216_v59 = vpop.permute.xlu2 %215 }
  0xc5   :  { %31 = vst.msk [vmem:[#allocation2 + $0x60] sm:$0xff] %vm18_vm14, %v1996_v62  ;;  %v297_v4 = vpop.permute.xlu0 %296  ;;  %v201_v5 = vpop.permute.xlu1 %200 }
  0xc6   :  { %32 = vst.msk [vmem:[#allocation2 + $0x68] sm:$0xff] %vm18_vm14, %v1996_v62 }
  0xc7   :  { %1837 = vmatmul.msk.f32.gmra.mxu0 %vm364_vm6, %v1995_v18  ;;  %1870 = vmatmul.msk.f32.gmra.mxu2 %vm430_vm7, %v1995_v18  ;;  %vm437_vm6 = vcmp.eq.s32.totalorder %v2251_v16, %v291_v0  ;;  %33 = vst.msk [vmem:[#allocation2 + $0x70] sm:$0xff] %vm18_vm14, %v1996_v62  ;;  %vm372_vm7 = vcmp.eq.s32.totalorder %v2239_v12, %v195_v1 }
  0xc8   :  { %1901 = vmatmul.msk.f32.gmra.mxu1 %vm365_vm8, %v1995_v18  ;;  %1934 = vmatmul.msk.f32.gmra.mxu3 %vm431_vm9, %v1995_v18  ;;  %vm438_vm8 = vcmp.eq.s32.totalorder %v2239_v12, %v294_v2  ;;  %34 = vst.msk [vmem:[#allocation2 + $0x78] sm:$0xff] %vm18_vm14, %v1996_v62  ;;  %vm373_vm9 = vcmp.eq.s32.totalorder %v2251_v16, %v195_v1 }
  0xc9   :  { %35 = vst.msk [vmem:[#allocation2 + $0x80] sm:$0xff] %vm18_vm14, %v1996_v62 }
  0xca   :  { %36 = vst.msk [vmem:[#allocation2 + $0x88] sm:$0xff] %vm18_vm14, %v1996_v62 }
  0xcb   :  { %37 = vst.msk [vmem:[#allocation2 + $0x90] sm:$0xff] %vm18_vm14, %v1996_v62 }
  0xcc   :  { %38 = vst.msk [vmem:[#allocation2 + $0x98] sm:$0xff] %vm18_vm14, %v1996_v62 }
  0xcd   :  { %39 = vst.msk [vmem:[#allocation2 + $0xa0] sm:$0xff] %vm18_vm14, %v1996_v62  ;;  %v204_v7 = vpop.permute.xlu0 %203  ;;  %v303_v11 = vpop.permute.xlu1 %302 }
  0xce   :  { %40 = vst.msk [vmem:[#allocation2 + $0xa8] sm:$0xff] %vm18_vm14, %v1996_v62 }
  0xcf   :  { %1838 = vmatmul.msk.f32.gmra.mxu0 %vm366_vm10, %v1995_v18  ;;  %1871 = vmatmul.msk.f32.gmra.mxu2 %vm432_vm11, %v1995_v18  ;;  %vm439_vm10 = vcmp.eq.s32.totalorder %v2251_v16, %v294_v2  ;;  %41 = vst.msk [vmem:[#allocation2 + $0xb0] sm:$0xff] %vm18_vm14, %v1996_v62  ;;  %vm374_vm11 = vcmp.eq.s32.totalorder %v2239_v12, %v198_v3 }
  0xd0   :  { %1902 = vmatmul.msk.f32.gmra.mxu1 %vm367_vm12, %v1995_v18  ;;  %1935 = vmatmul.msk.f32.gmra.mxu3 %vm433_vm13, %v1995_v18  ;;  %vm440_vm12 = vcmp.eq.s32.totalorder %v2239_v12, %v297_v4  ;;  %42 = vst.msk [vmem:[#allocation2 + $0xb8] sm:$0xff] %vm18_vm14, %v1996_v62  ;;  %vm375_vm13 = vcmp.eq.s32.totalorder %v2251_v16, %v198_v3 }
  0xd1   :  { %43 = vst.msk [vmem:[#allocation2 + $0xc0] sm:$0xff] %vm18_vm14, %v1996_v62 }
  0xd2   :  { %44 = vst.msk [vmem:[#allocation2 + $0xc8] sm:$0xff] %vm18_vm14, %v1996_v62 }
  0xd3   :  { %45 = vst.msk [vmem:[#allocation2 + $0xd0] sm:$0xff] %vm18_vm14, %v1996_v62 }
  0xd4   :  { %46 = vst.msk [vmem:[#allocation2 + $0xd8] sm:$0xff] %vm18_vm14, %v1996_v62 }
  0xd5   :  { %47 = vst.msk [vmem:[#allocation2 + $0xe0] sm:$0xff] %vm18_vm14, %v1996_v62  ;;  %v306_v21 = vpop.permute.xlu0 %305  ;;  %v210_v28 = vpop.permute.xlu1 %209 }
  0xd6   :  { %48 = vst.msk [vmem:[#allocation2 + $0xe8] sm:$0xff] %vm18_vm14, %v1996_v62 }
  0xd7   :  { %1839 = vmatmul.msk.f32.gmra.mxu0 %vm368_vm15, %v1995_v18  ;;  %1872 = vmatmul.msk.f32.gmra.mxu2 %vm434_vm0, %v1995_v18  ;;  %vm441_vm15 = vcmp.eq.s32.totalorder %v2251_v16, %v297_v4  ;;  %49 = vst.msk [vmem:[#allocation2 + $0xf0] sm:$0xff] %vm18_vm14, %v1996_v62  ;;  %vm376_vm0 = vcmp.eq.s32.totalorder %v2239_v12, %v201_v5 }
  0xd8   :  { %1903 = vmatmul.msk.f32.gmra.mxu1 %vm369_vm1, %v1995_v18  ;;  %1936 = vmatmul.msk.f32.gmra.mxu3 %vm435_vm2, %v1995_v18  ;;  %vm442_vm1 = vcmp.eq.s32.totalorder %v2239_v12, %v300_v6  ;;  %50 = vst.msk [vmem:[#allocation2 + $0xf8] sm:$0xff] %vm18_vm14, %v1996_v62  ;;  %vm377_vm2 = vcmp.eq.s32.totalorder %v2251_v16, %v201_v5  ;;  %v1440_v5 = vld [vmem:[%s3213_s2] sm:$0xff] }
  0xd9   :  { %52 = vst.msk [vmem:[#allocation2 + $0x108] sm:$0xff] %vm18_vm14, %v1996_v62 }
  0xda   :  { %53 = vst.msk [vmem:[#allocation2 + $0x110] sm:$0xff] %vm18_vm14, %v1996_v62 }
  0xdb   :  { %54 = vst.msk [vmem:[#allocation2 + $0x118] sm:$0xff] %vm18_vm14, %v1996_v62 }
  0xdc   :  { %55 = vst.msk [vmem:[#allocation2 + $0x120] sm:$0xff] %vm18_vm14, %v1996_v62 }
  0xdd   :  { %56 = vst.msk [vmem:[#allocation2 + $0x128] sm:$0xff] %vm18_vm14, %v1996_v62  ;;  %v213_v36 = vpop.permute.xlu0 %212  ;;  %v312_v42 = vpop.permute.xlu1 %311 }
  0xde   :  { %57 = vst.msk [vmem:[#allocation2 + $0x130] sm:$0xff] %vm18_vm14, %v1996_v62 }
  0xdf   :  { %1840 = vmatmul.msk.f32.gmra.mxu0 %vm370_vm3, %v1995_v18  ;;  %1873 = vmatmul.msk.f32.gmra.mxu2 %vm436_vm4, %v1995_v18  ;;  %vm443_vm3 = vcmp.eq.s32.totalorder %v2251_v16, %v300_v6  ;;  %58 = vst.msk [vmem:[#allocation2 + $0x138] sm:$0xff] %vm18_vm14, %v1996_v62  ;;  %vm378_vm4 = vcmp.eq.s32.totalorder %v2239_v12, %v204_v7  ;;  %v734_v6 = vld [vmem:[#allocation2 + $0x20] sm:$0xff] }
  0xe0   :  { %1904 = vmatmul.msk.f32.gmra.mxu1 %vm371_vm5, %v1995_v18  ;;  %1937 = vmatmul.msk.f32.gmra.mxu3 %vm437_vm6, %v1995_v18  ;;  %59 = vst.msk [vmem:[#allocation2 + $0x140] sm:$0xff] %vm18_vm14, %v1996_v62  ;;  %vm444_vm5 = vcmp.eq.s32.totalorder %v2239_v12, %v303_v11  ;;  %vm379_vm6 = vcmp.eq.s32.totalorder %v2251_v16, %v204_v7  ;;  %v763_v39 = vld [vmem:[#allocation2 + $0x108] sm:$0xff] }
  0xe1   :  { %60 = vst.msk [vmem:[#allocation2 + $0x148] sm:$0xff] %vm18_vm14, %v1996_v62  ;;  %v764_v47 = vld [vmem:[#allocation2 + $0x110] sm:$0xff] }
  0xe2   :  { %61 = vst.msk [vmem:[#allocation2 + $0x150] sm:$0xff] %vm18_vm14, %v1996_v62  ;;  %v765_v55 = vld [vmem:[#allocation2 + $0x118] sm:$0xff] }
  0xe3   :  { %62 = vst.msk [vmem:[#allocation2 + $0x158] sm:$0xff] %vm18_vm14, %v1996_v62  ;;  %v766_v1 = vld [vmem:[#allocation2 + $0x120] sm:$0xff] }
  0xe4   :  { %63 = vst.msk [vmem:[#allocation2 + $0x160] sm:$0xff] %vm18_vm14, %v1996_v62 }
  0xe5   :  { %64 = vst.msk [vmem:[#allocation2 + $0x168] sm:$0xff] %vm18_vm14, %v1996_v62  ;;  %v315_v0 = vpop.permute.xlu0 %314 }
  0xe6   :  { %65 = vst.msk [vmem:[#allocation2 + $0x170] sm:$0xff] %vm18_vm14, %v1996_v62 }
  0xe7   :  { %1841 = vmatmul.msk.f32.gmra.mxu0 %vm372_vm7, %v1995_v18  ;;  %1874 = vmatmul.msk.f32.gmra.mxu2 %vm438_vm8, %v1995_v18  ;;  %vm445_vm7 = vcmp.eq.s32.totalorder %v2251_v16, %v303_v11  ;;  %66 = vst.msk [vmem:[#allocation2 + $0x178] sm:$0xff] %vm18_vm14, %v1996_v62  ;;  %vm380_vm8 = vcmp.eq.s32.totalorder %v2239_v12, %v207_v19 }
  0xe8   :  { %1905 = vmatmul.msk.f32.gmra.mxu1 %vm373_vm9, %v1995_v18  ;;  %1938 = vmatmul.msk.f32.gmra.mxu3 %vm439_vm10, %v1995_v18  ;;  %vm446_vm9 = vcmp.eq.s32.totalorder %v2239_v12, %v306_v21  ;;  %67 = vst.msk [vmem:[#allocation2 + $0x180] sm:$0xff] %vm18_vm14, %v1996_v62  ;;  %vm381_vm10 = vcmp.eq.s32.totalorder %v2251_v16, %v207_v19 }
  0xe9   :  { %68 = vst.msk [vmem:[#allocation2 + $0x188] sm:$0xff] %vm18_vm14, %v1996_v62 }
  0xea   :  { %69 = vst.msk [vmem:[#allocation2 + $0x190] sm:$0xff] %vm18_vm14, %v1996_v62 }
  0xeb   :  { %70 = vst.msk [vmem:[#allocation2 + $0x198] sm:$0xff] %vm18_vm14, %v1996_v62 }
  0xec   :  { %71 = vst.msk [vmem:[#allocation2 + $0x1a0] sm:$0xff] %vm18_vm14, %v1996_v62 }
  0xed   :  { %72 = vst.msk [vmem:[#allocation2 + $0x1a8] sm:$0xff] %vm18_vm14, %v1996_v62 }
  0xee   :  { %73 = vst.msk [vmem:[#allocation2 + $0x1b0] sm:$0xff] %vm18_vm14, %v1996_v62 }
  0xef   :  { %1842 = vmatmul.msk.f32.gmra.mxu0 %vm374_vm11, %v1995_v18  ;;  %1875 = vmatmul.msk.f32.gmra.mxu2 %vm440_vm12, %v1995_v18  ;;  %vm447_vm11 = vcmp.eq.s32.totalorder %v2251_v16, %v306_v21  ;;  %vm382_vm12 = vcmp.eq.s32.totalorder %v2239_v12, %v210_v28  ;;  %74 = vst.msk [vmem:[#allocation2 + $0x1b8] sm:$0xff] %vm18_vm14, %v1996_v62 }
  0xf0   :  { %1906 = vmatmul.msk.f32.gmra.mxu1 %vm375_vm13, %v1995_v18  ;;  %1939 = vmatmul.msk.f32.gmra.mxu3 %vm441_vm15, %v1995_v18  ;;  %vm448_vm13 = vcmp.eq.s32.totalorder %v2239_v12, %v309_v31  ;;  %vm383_vm15 = vcmp.eq.s32.totalorder %v2251_v16, %v210_v28  ;;  %75 = vst.msk [vmem:[#allocation2 + $0x1c0] sm:$0xff] %vm18_vm14, %v1996_v62  ;;  %v1475_v28 = vld [vmem:[%s3213_s2 + $0x118] sm:$0xff] }
  0xf1   :  { %76 = vst.msk [vmem:[#allocation2 + $0x1c8] sm:$0xff] %vm18_vm14, %v1996_v62 }
  0xf2   :  { %77 = vst.msk [vmem:[#allocation2 + $0x1d0] sm:$0xff] %vm18_vm14, %v1996_v62 }
  0xf3   :  { %78 = vst.msk [vmem:[#allocation2 + $0x1d8] sm:$0xff] %vm18_vm14, %v1996_v62 }
  0xf4   :  { %79 = vst.msk [vmem:[#allocation2 + $0x1e0] sm:$0xff] %vm18_vm14, %v1996_v62 }
  0xf5   :  { %80 = vst.msk [vmem:[#allocation2 + $0x1e8] sm:$0xff] %vm18_vm14, %v1996_v62 }
  0xf6   :  { %81 = vst.msk [vmem:[#allocation2 + $0x1f0] sm:$0xff] %vm18_vm14, %v1996_v62 }
  0xf7   :  { %1843 = vmatmul.msk.f32.gmra.mxu0 %vm376_vm0, %v1995_v18  ;;  %1876 = vmatmul.msk.f32.gmra.mxu2 %vm442_vm1, %v1995_v18  ;;  %vm449_vm0 = vcmp.eq.s32.totalorder %v2251_v16, %v309_v31  ;;  %vm384_vm1 = vcmp.eq.s32.totalorder %v2239_v12, %v213_v36  ;;  %82 = vst.msk [vmem:[#allocation2 + $0x1f8] sm:$0xff] %vm18_vm14, %v1996_v62 }
  0xf8   :  { %1907 = vmatmul.msk.f32.gmra.mxu1 %vm377_vm2, %v1995_v18  ;;  %1940 = vmatmul.msk.f32.gmra.mxu3 %vm443_vm3, %v1995_v18  ;;  %vm450_vm2 = vcmp.eq.s32.totalorder %v2239_v12, %v312_v42  ;;  %vm385_vm3 = vcmp.eq.s32.totalorder %v2251_v16, %v213_v36 }
  0xfa   :  { %v939_v8 = vpop.f32.mrf.mxu2  ;;  %v1148_v10 = vpop.f32.mrf.mxu3 }
  0xfb   :  { %v1149_v13 = vadd.f32 %v1148_v10, %v939_v8  ;;  %v1473_v8 = vld [vmem:[%s3213_s2 + $0x108] sm:$0xff] }
  0xfc   :  { %v2520_v14 = vpop.f32.mrf.mxu0 }
  0xfd   :  { %v1276_v15 = vadd.f32 %v1149_v13, %v762_v9  ;;  %v1052_v17 = vpop.f32.mrf.mxu1  ;;  %v1441_v13 = vld [vmem:[%s3213_s2 + $0x8] sm:$0xff] }
  0xfe   :  { %v1053_v35 = vadd.f32 %v1052_v17, %v2520_v14  ;;  %v1474_v17 = vld [vmem:[%s3213_s2 + $0x110] sm:$0xff] }
  0xff   :  { %1341 = vst.msk [vmem:[#allocation2 + $0x100] sm:$0xff] %vm18_vm14, %v1276_v15  ;;  %1844 = vmatmul.msk.f32.gmra.mxu0 %vm378_vm4, %v1995_v18  ;;  %1877 = vmatmul.msk.f32.gmra.mxu2 %vm444_vm5, %v1995_v18  ;;  %vm451_vm4 = vcmp.eq.s32.totalorder %v2251_v16, %v312_v42  ;;  %vm386_vm5 = vcmp.eq.s32.totalorder %v2239_v12, %v216_v59 }
 0x100   :  { %1908 = vmatmul.msk.f32.gmra.mxu1 %vm379_vm6, %v1995_v18  ;;  %1941 = vmatmul.msk.f32.gmra.mxu3 %vm445_vm7, %v1995_v18  ;;  %v1244_v46 = vadd.f32 %v1053_v35, %v730_v37  ;;  %vm452_vm6 = vcmp.eq.s32.totalorder %v2239_v12, %v315_v0  ;;  %vm387_vm7 = vcmp.eq.s32.totalorder %v2251_v16, %v216_v59 }
 0x102   :  { %v942_v20 = vpop.f32.mrf.mxu2  ;;  %1309 = vst.msk [vmem:[#allocation2] sm:$0xff] %vm18_vm14, %v1244_v46 }
 0x103   :  { %v1151_v22 = vpop.f32.mrf.mxu3 }
 0x104   :  { %v846_v24 = vpop.f32.mrf.mxu0  ;;  %v1152_v38 = vadd.f32 %v1151_v22, %v942_v20  ;;  %v219_v20 = vpop.permute.xlu1 %218 }
 0x105   :  { %v1055_v25 = vpop.f32.mrf.mxu1 }
 0x106   :  { %v1408_v26 = vld [vmem:[#allocation2 + $0x100] sm:$0xff]  ;;  %v1056_v40 = vadd.f32 %v1055_v25, %v846_v24  ;;  %v1277_v50 = vadd.f32 %v1152_v38, %v763_v39  ;;  %v318_v24 = vpop.permute.xlu2 %317  ;;  %v767_v38 = vld [vmem:[#allocation2 + $0x128] sm:$0xff] }
 0x107   :  { %v1536_v27 = vadd.f32 %v1472_v23, %v1408_v26  ;;  %1845 = vmatmul.msk.f32.gmra.mxu0 %vm380_vm8, %v1995_v18  ;;  %1878 = vmatmul.msk.f32.gmra.mxu2 %vm446_vm9, %v1995_v18  ;;  %vm453_vm8 = vcmp.eq.s32.totalorder %v2251_v16, %v315_v0  ;;  %v1442_v23 = vld [vmem:[%s3213_s2 + $0x10] sm:$0xff]  ;;  %vm454_vm9 = vcmp.eq.s32.totalorder %v2239_v12, %v318_v24 }
 0x108   :  { %1909 = vmatmul.msk.f32.gmra.mxu1 %vm381_vm10, %v1995_v18  ;;  %1942 = vmatmul.msk.f32.gmra.mxu3 %vm447_vm11, %v1995_v18  ;;  %v1245_v54 = vadd.f32 %v1056_v40, %v731_v43  ;;  %1342 = vst.msk [vmem:[#allocation2 + $0x108] sm:$0xff] %vm18_vm14, %v1277_v50  ;;  %vm455_vm10 = vcmp.eq.s32.totalorder %v2251_v16, %v318_v24 }
 0x109   :  { %v1600_v29 = vmax.f32 %v1536_v27, 0.0  ;;  %v1376_v11 = vld [vmem:[#allocation2] sm:$0xff]  ;;  %vm388_vm11 = vcmp.eq.s32.totalorder %v2239_v12, %v219_v20 }
 0x10a   :  { %v945_v30 = vpop.f32.mrf.mxu2  ;;  %1310 = vst.msk [vmem:[#allocation2 + $0x8] sm:$0xff] %vm18_vm14, %v1245_v54  ;;  %v1504_v14 = vadd.f32 %v1440_v5, %v1376_v11 }
 0x10b   :  { %1664 = vst.msk [vmem:[%s3214_s3 + $0x100] sm:$0xff] %vm18_vm14, %v1600_v29  ;;  %v1154_v32 = vpop.f32.mrf.mxu3 }
 0x10c   :  { %v849_v33 = vpop.f32.mrf.mxu0  ;;  %v1155_v44 = vadd.f32 %v1154_v32, %v945_v30  ;;  %v1568_v25 = vmax.f32 %v1504_v14, 0.0 }
 0x10d   :  { %v1058_v34 = vpop.f32.mrf.mxu1 }
 0x10e   :  { %v1059_v48 = vadd.f32 %v1058_v34, %v849_v33  ;;  %v1278_v57 = vadd.f32 %v1155_v44, %v764_v47  ;;  %v1443_v33 = vld [vmem:[%s3213_s2 + $0x18] sm:$0xff]  ;;  %1632 = vst.msk [vmem:[%s3214_s3] sm:$0xff] %vm18_vm14, %v1568_v25  ;;  %v1476_v44 = vld [vmem:[%s3213_s2 + $0x120] sm:$0xff] }
 0x10f   :  { %1846 = vmatmul.msk.f32.gmra.mxu0 %vm382_vm12, %v1995_v18  ;;  %1879 = vmatmul.msk.f32.gmra.mxu2 %vm448_vm13, %v1995_v18  ;;  %v1409_v15 = vld [vmem:[#allocation2 + $0x108] sm:$0xff]  ;;  %vm389_vm12 = vcmp.eq.s32.totalorder %v2251_v16, %v219_v20 }
 0x110   :  { %1910 = vmatmul.msk.f32.gmra.mxu1 %vm383_vm15, %v1995_v18  ;;  %1943 = vmatmul.msk.f32.gmra.mxu3 %vm449_vm0, %v1995_v18  ;;  %v1246_v60 = vadd.f32 %v1059_v48, %v732_v51  ;;  %1343 = vst.msk [vmem:[#allocation2 + $0x110] sm:$0xff] %vm18_vm14, %v1278_v57  ;;  %v1537_v21 = vadd.f32 %v1473_v8, %v1409_v15  ;;  %v735_v48 = vld [vmem:[#allocation2 + $0x28] sm:$0xff] }
 0x111   :  { %v1377_v22 = vld [vmem:[#allocation2 + $0x8] sm:$0xff] }
 0x112   :  { %v948_v41 = vpop.f32.mrf.mxu2  ;;  %1311 = vst.msk [vmem:[#allocation2 + $0x10] sm:$0xff] %vm18_vm14, %v1246_v60  ;;  %v1505_v26 = vadd.f32 %v1441_v13, %v1377_v22  ;;  %v1601_v30 = vmax.f32 %v1537_v21, 0.0  ;;  %v1477_v8 = vld [vmem:[%s3213_s2 + $0x128] sm:$0xff] }
 0x113   :  { %v1157_v45 = vpop.f32.mrf.mxu3  ;;  %v1445_v13 = vld [vmem:[%s3213_s2 + $0x28] sm:$0xff] }
 0x114   :  { %v852_v49 = vpop.f32.mrf.mxu0  ;;  %v1158_v52 = vadd.f32 %v1157_v45, %v948_v41  ;;  %v1569_v35 = vmax.f32 %v1505_v26, 0.0  ;;  %1665 = vst.msk [vmem:[%s3214_s3 + $0x108] sm:$0xff] %vm18_vm14, %v1601_v30  ;;  %v1478_v26 = vld [vmem:[%s3213_s2 + $0x130] sm:$0xff] }
 0x115   :  { %v1061_v53 = vpop.f32.mrf.mxu1 }
 0x116   :  { %v1062_v56 = vadd.f32 %v1061_v53, %v852_v49  ;;  %v1279_v61 = vadd.f32 %v1158_v52, %v765_v55  ;;  %1633 = vst.msk [vmem:[%s3214_s3 + $0x8] sm:$0xff] %vm18_vm14, %v1569_v35  ;;  %v1444_v52 = vld [vmem:[%s3213_s2 + $0x20] sm:$0xff] }
 0x117   :  { %1847 = vmatmul.msk.f32.gmra.mxu0 %vm384_vm1, %v1995_v18  ;;  %1880 = vmatmul.msk.f32.gmra.mxu2 %vm450_vm2, %v1995_v18  ;;  %v1410_v27 = vld [vmem:[#allocation2 + $0x110] sm:$0xff] }
 0x118   :  { %1911 = vmatmul.msk.f32.gmra.mxu1 %vm385_vm3, %v1995_v18  ;;  %1944 = vmatmul.msk.f32.gmra.mxu3 %vm451_vm4, %v1995_v18  ;;  %v1247_v62 = vadd.f32 %v1062_v56, %v733_v58  ;;  %1344 = vst.msk [vmem:[#allocation2 + $0x118] sm:$0xff] %vm18_vm14, %v1279_v61  ;;  %v1538_v31 = vadd.f32 %v1474_v17, %v1410_v27  ;;  %v222_v56 = vpop.permute.xlu0 %221  ;;  %v737_v27 = vld [vmem:[#allocation2 + $0x38] sm:$0xff] }
 0x119   :  { %v1378_v32 = vld [vmem:[#allocation2 + $0x10] sm:$0xff]  ;;  %vm390_vm13 = vcmp.eq.s32.totalorder %v2239_v12, %v222_v56  ;;  %vm391_vm0 = vcmp.eq.s32.totalorder %v2251_v16, %v222_v56 }
 0x11a   :  { %v951_v63 = vpop.f32.mrf.mxu2  ;;  %1312 = vst.msk [vmem:[#allocation2 + $0x18] sm:$0xff] %vm18_vm14, %v1247_v62  ;;  %v1506_v36 = vadd.f32 %v1442_v23, %v1378_v32  ;;  %v1602_v41 = vmax.f32 %v1538_v31, 0.0  ;;  %v321_v62 = vpop.permute.xlu1 %320 }
 0x11b   :  { %v1160_v2 = vpop.f32.mrf.mxu3  ;;  %vm456_vm15 = vcmp.eq.s32.totalorder %v2239_v12, %v321_v62  ;;  %vm457_vm1 = vcmp.eq.s32.totalorder %v2251_v16, %v321_v62  ;;  %v771_v62 = vld [vmem:[#allocation2 + $0x148] sm:$0xff] }
 0x11c   :  { %v1161_v3 = vadd.f32 %v1160_v2, %v951_v63  ;;  %v855_v4 = vpop.f32.mrf.mxu0  ;;  %v1570_v46 = vmax.f32 %v1506_v36, 0.0  ;;  %1666 = vst.msk [vmem:[%s3214_s3 + $0x110] sm:$0xff] %vm18_vm14, %v1602_v41  ;;  %v768_v63 = vld [vmem:[#allocation2 + $0x130] sm:$0xff] }
 0x11d   :  { %v1064_v7 = vpop.f32.mrf.mxu1 }
 0x11e   :  { %v1280_v9 = vadd.f32 %v1161_v3, %v766_v1  ;;  %v1065_v10 = vadd.f32 %v1064_v7, %v855_v4  ;;  %1634 = vst.msk [vmem:[%s3214_s3 + $0x10] sm:$0xff] %vm18_vm14, %v1570_v46  ;;  %v736_v4 = vld [vmem:[#allocation2 + $0x30] sm:$0xff] }
 0x11f   :  { %1848 = vmatmul.msk.f32.gmra.mxu0 %vm386_vm5, %v1995_v18  ;;  %1881 = vmatmul.msk.f32.gmra.mxu2 %vm452_vm6, %v1995_v18  ;;  %v1411_v37 = vld [vmem:[#allocation2 + $0x118] sm:$0xff] }
 0x120   :  { %1345 = vst.msk [vmem:[#allocation2 + $0x120] sm:$0xff] %vm18_vm14, %v1280_v9  ;;  %v1248_v19 = vadd.f32 %v1065_v10, %v734_v6  ;;  %1912 = vmatmul.msk.f32.gmra.mxu1 %vm387_vm7, %v1995_v18  ;;  %1945 = vmatmul.msk.f32.gmra.mxu3 %vm453_vm8, %v1995_v18  ;;  %v1539_v42 = vadd.f32 %v1475_v28, %v1411_v37  ;;  %v225_v10 = vpop.permute.xlu2 %224  ;;  %v324_v15 = vpop.permute.xlu0 %323 }
 0x121   :  { %v1379_v43 = vld [vmem:[#allocation2 + $0x18] sm:$0xff]  ;;  %vm458_vm2 = vcmp.eq.s32.totalorder %v2239_v12, %v324_v15  ;;  %vm392_vm3 = vcmp.eq.s32.totalorder %v2239_v12, %v225_v10  ;;  %vm459_vm4 = vcmp.eq.s32.totalorder %v2251_v16, %v324_v15  ;;  %vm393_vm5 = vcmp.eq.s32.totalorder %v2251_v16, %v225_v10 }
 0x122   :  { %1313 = vst.msk [vmem:[#allocation2 + $0x20] sm:$0xff] %vm18_vm14, %v1248_v19  ;;  %v954_v29 = vpop.f32.mrf.mxu2  ;;  %v1507_v47 = vadd.f32 %v1443_v33, %v1379_v43  ;;  %v1603_v50 = vmax.f32 %v1539_v42, 0.0  ;;  %v769_v19 = vld [vmem:[#allocation2 + $0x138] sm:$0xff]  ;;  %v1446_v33 = vld [vmem:[%s3213_s2 + $0x30] sm:$0xff]  ;;  %v228_v36 = vpop.permute.xlu1 %227  ;;  %v770_v42 = vld [vmem:[#allocation2 + $0x140] sm:$0xff] }
 0x123   :  { %v1163_v34 = vpop.f32.mrf.mxu3  ;;  %vm394_vm7 = vcmp.eq.s32.totalorder %v2239_v12, %v228_v36 }
 0x124   :  { %v1164_v39 = vadd.f32 %v1163_v34, %v954_v29  ;;  %v858_v40 = vpop.f32.mrf.mxu0  ;;  %v1571_v54 = vmax.f32 %v1507_v47, 0.0  ;;  %1667 = vst.msk [vmem:[%s3214_s3 + $0x118] sm:$0xff] %vm18_vm14, %v1603_v50  ;;  %v1479_v47 = vld [vmem:[%s3213_s2 + $0x138] sm:$0xff] }
 0x125   :  { %v1067_v45 = vpop.f32.mrf.mxu1 }
 0x126   :  { %v1068_v49 = vadd.f32 %v1067_v45, %v858_v40  ;;  %v1281_v53 = vadd.f32 %v1164_v39, %v767_v38  ;;  %1635 = vst.msk [vmem:[%s3214_s3 + $0x18] sm:$0xff] %vm18_vm14, %v1571_v54 }
 0x127   :  { %v1412_v51 = vld [vmem:[#allocation2 + $0x120] sm:$0xff]  ;;  %1849 = vmatmul.msk.f32.gmra.mxu0 %vm388_vm11, %v1995_v18  ;;  %1882 = vmatmul.msk.f32.gmra.mxu2 %vm454_vm9, %v1995_v18  ;;  %vm395_vm9 = vcmp.eq.s32.totalorder %v2251_v16, %v228_v36 }
 0x128   :  { %v1540_v55 = vadd.f32 %v1476_v44, %v1412_v51  ;;  %1913 = vmatmul.msk.f32.gmra.mxu1 %vm389_vm12, %v1995_v18  ;;  %1946 = vmatmul.msk.f32.gmra.mxu3 %vm455_vm10, %v1995_v18  ;;  %v1249_v58 = vadd.f32 %v1068_v49, %v735_v48  ;;  %1346 = vst.msk [vmem:[#allocation2 + $0x128] sm:$0xff] %vm18_vm14, %v1281_v53  ;;  %v327_v41 = vpop.permute.xlu2 %326  ;;  %v738_v48 = vld [vmem:[#allocation2 + $0x40] sm:$0xff]  ;;  %v1447_v53 = vld [vmem:[%s3213_s2 + $0x38] sm:$0xff]  ;;  %v231_v56 = vpop.permute.xlu0 %230 }
 0x129   :  { %v1380_v57 = vld [vmem:[#allocation2 + $0x20] sm:$0xff]  ;;  %vm460_vm6 = vcmp.eq.s32.totalorder %v2239_v12, %v327_v41  ;;  %vm461_vm8 = vcmp.eq.s32.totalorder %v2251_v16, %v327_v41  ;;  %vm396_vm11 = vcmp.eq.s32.totalorder %v2239_v12, %v231_v56  ;;  %v773_v41 = vld [vmem:[#allocation2 + $0x158] sm:$0xff] }
 0x12a   :  { %v1604_v59 = vmax.f32 %v1540_v55, 0.0  ;;  %v1508_v60 = vadd.f32 %v1444_v52, %v1380_v57  ;;  %v957_v61 = vpop.f32.mrf.mxu2  ;;  %1314 = vst.msk [vmem:[#allocation2 + $0x28] sm:$0xff] %vm18_vm14, %v1249_v58 }
 0x12b   :  { %v1166_v0 = vpop.f32.mrf.mxu3 }
 0x12c   :  { %1668 = vst.msk [vmem:[%s3214_s3 + $0x120] sm:$0xff] %vm18_vm14, %v1604_v59  ;;  %v1572_v1 = vmax.f32 %v1508_v60, 0.0  ;;  %v1167_v2 = vadd.f32 %v1166_v0, %v957_v61  ;;  %v861_v3 = vpop.f32.mrf.mxu0  ;;  %v330_v61 = vpop.permute.xlu1 %329 }
 0x12d   :  { %v1070_v5 = vpop.f32.mrf.mxu1  ;;  %vm462_vm10 = vcmp.eq.s32.totalorder %v2239_v12, %v330_v61  ;;  %vm463_vm12 = vcmp.eq.s32.totalorder %v2251_v16, %v330_v61  ;;  %v774_v61 = vld [vmem:[#allocation2 + $0x160] sm:$0xff] }
 0x12e   :  { %1636 = vst.msk [vmem:[%s3214_s3 + $0x20] sm:$0xff] %vm18_vm14, %v1572_v1  ;;  %v1282_v6 = vadd.f32 %v1167_v2, %v768_v63  ;;  %v1071_v7 = vadd.f32 %v1070_v5, %v861_v3  ;;  %v1480_v3 = vld [vmem:[%s3213_s2 + $0x140] sm:$0xff] }
 0x12f   :  { %1850 = vmatmul.msk.f32.gmra.mxu0 %vm390_vm13, %v1995_v18  ;;  %1883 = vmatmul.msk.f32.gmra.mxu2 %vm456_vm15, %v1995_v18  ;;  %v1413_v11 = vld [vmem:[#allocation2 + $0x128] sm:$0xff]  ;;  %vm397_vm13 = vcmp.eq.s32.totalorder %v2251_v16, %v231_v56 }
 0x130   :  { %1347 = vst.msk [vmem:[#allocation2 + $0x130] sm:$0xff] %vm18_vm14, %v1282_v6  ;;  %v1250_v9 = vadd.f32 %v1071_v7, %v736_v4  ;;  %1914 = vmatmul.msk.f32.gmra.mxu1 %vm391_vm0, %v1995_v18  ;;  %1947 = vmatmul.msk.f32.gmra.mxu3 %vm457_vm1, %v1995_v18  ;;  %v1541_v17 = vadd.f32 %v1477_v8, %v1413_v11  ;;  %v739_v4 = vld [vmem:[#allocation2 + $0x48] sm:$0xff] }
 0x131   :  { %v1381_v21 = vld [vmem:[#allocation2 + $0x28] sm:$0xff] }
 0x132   :  { %1315 = vst.msk [vmem:[#allocation2 + $0x30] sm:$0xff] %vm18_vm14, %v1250_v9  ;;  %v960_v14 = vpop.f32.mrf.mxu2  ;;  %v1605_v24 = vmax.f32 %v1541_v17, 0.0  ;;  %v1509_v25 = vadd.f32 %v1445_v13, %v1381_v21  ;;  %v1448_v9 = vld [vmem:[%s3213_s2 + $0x40] sm:$0xff]  ;;  %v234_v13 = vpop.permute.xlu2 %233  ;;  %v772_v21 = vld [vmem:[#allocation2 + $0x150] sm:$0xff] }
 0x133   :  { %v1169_v20 = vpop.f32.mrf.mxu3  ;;  %vm398_vm15 = vcmp.eq.s32.totalorder %v2239_v12, %v234_v13  ;;  %vm399_vm1 = vcmp.eq.s32.totalorder %v2251_v16, %v234_v13 }
 0x134   :  { %v1170_v22 = vadd.f32 %v1169_v20, %v960_v14  ;;  %v864_v23 = vpop.f32.mrf.mxu0  ;;  %1669 = vst.msk [vmem:[%s3214_s3 + $0x128] sm:$0xff] %vm18_vm14, %v1605_v24  ;;  %v1573_v31 = vmax.f32 %v1509_v25, 0.0  ;;  %v333_v20 = vpop.permute.xlu0 %332 }
 0x135   :  { %v1073_v28 = vpop.f32.mrf.mxu1  ;;  %vm464_vm0 = vcmp.eq.s32.totalorder %v2239_v12, %v333_v20 }
 0x136   :  { %v1283_v29 = vadd.f32 %v1170_v22, %v769_v19  ;;  %v1074_v30 = vadd.f32 %v1073_v28, %v864_v23  ;;  %1637 = vst.msk [vmem:[%s3214_s3 + $0x28] sm:$0xff] %vm18_vm14, %v1573_v31 }
 0x137   :  { %v1414_v32 = vld [vmem:[#allocation2 + $0x130] sm:$0xff]  ;;  %1851 = vmatmul.msk.f32.gmra.mxu0 %vm392_vm3, %v1995_v18  ;;  %1884 = vmatmul.msk.f32.gmra.mxu2 %vm458_vm2, %v1995_v18  ;;  %vm465_vm2 = vcmp.eq.s32.totalorder %v2251_v16, %v333_v20  ;;  %v775_v20 = vld [vmem:[#allocation2 + $0x168] sm:$0xff] }
 0x138   :  { %v1542_v34 = vadd.f32 %v1478_v26, %v1414_v32  ;;  %1348 = vst.msk [vmem:[#allocation2 + $0x138] sm:$0xff] %vm18_vm14, %v1283_v29  ;;  %v1251_v35 = vadd.f32 %v1074_v30, %v737_v27  ;;  %1915 = vmatmul.msk.f32.gmra.mxu1 %vm393_vm5, %v1995_v18  ;;  %1948 = vmatmul.msk.f32.gmra.mxu3 %vm459_vm4, %v1995_v18  ;;  %v1481_v26 = vld [vmem:[%s3213_s2 + $0x148] sm:$0xff]  ;;  %v740_v27 = vld [vmem:[#allocation2 + $0x50] sm:$0xff] }
 0x139   :  { %v1382_v37 = vld [vmem:[#allocation2 + $0x30] sm:$0xff]  ;;  %v1449_v32 = vld [vmem:[%s3213_s2 + $0x48] sm:$0xff] }
 0x13a   :  { %v1606_v38 = vmax.f32 %v1542_v34, 0.0  ;;  %v1510_v39 = vadd.f32 %v1446_v33, %v1382_v37  ;;  %1316 = vst.msk [vmem:[#allocation2 + $0x38] sm:$0xff] %vm18_vm14, %v1251_v35  ;;  %v963_v40 = vpop.f32.mrf.mxu2  ;;  %v237_v35 = vpop.permute.xlu1 %236 }
 0x13b   :  { %v1172_v43 = vpop.f32.mrf.mxu3  ;;  %vm400_vm4 = vcmp.eq.s32.totalorder %v2239_v12, %v237_v35 }
 0x13c   :  { %1670 = vst.msk [vmem:[%s3214_s3 + $0x130] sm:$0xff] %vm18_vm14, %v1606_v38  ;;  %v1574_v44 = vmax.f32 %v1510_v39, 0.0  ;;  %v1173_v45 = vadd.f32 %v1172_v43, %v963_v40  ;;  %v867_v46 = vpop.f32.mrf.mxu0  ;;  %v336_v40 = vpop.permute.xlu2 %335 }
 0x13d   :  { %v1076_v49 = vpop.f32.mrf.mxu1  ;;  %vm466_vm3 = vcmp.eq.s32.totalorder %v2239_v12, %v336_v40  ;;  %vm467_vm5 = vcmp.eq.s32.totalorder %v2251_v16, %v336_v40  ;;  %v776_v40 = vld [vmem:[#allocation2 + $0x170] sm:$0xff] }
 0x13e   :  { %1638 = vst.msk [vmem:[%s3214_s3 + $0x30] sm:$0xff] %vm18_vm14, %v1574_v44  ;;  %v1284_v50 = vadd.f32 %v1173_v45, %v770_v42  ;;  %v1077_v51 = vadd.f32 %v1076_v49, %v867_v46  ;;  %v1482_v46 = vld [vmem:[%s3213_s2 + $0x150] sm:$0xff] }
 0x13f   :  { %v1415_v52 = vld [vmem:[#allocation2 + $0x138] sm:$0xff]  ;;  %1852 = vmatmul.msk.f32.gmra.mxu0 %vm394_vm7, %v1995_v18  ;;  %1885 = vmatmul.msk.f32.gmra.mxu2 %vm460_vm6, %v1995_v18  ;;  %vm401_vm6 = vcmp.eq.s32.totalorder %v2251_v16, %v237_v35 }
 0x140   :  { %v1543_v54 = vadd.f32 %v1479_v47, %v1415_v52  ;;  %1349 = vst.msk [vmem:[#allocation2 + $0x140] sm:$0xff] %vm18_vm14, %v1284_v50  ;;  %v1252_v55 = vadd.f32 %v1077_v51, %v738_v48  ;;  %1916 = vmatmul.msk.f32.gmra.mxu1 %vm395_vm9, %v1995_v18  ;;  %1949 = vmatmul.msk.f32.gmra.mxu3 %vm461_vm8, %v1995_v18  ;;  %v741_v47 = vld [vmem:[#allocation2 + $0x58] sm:$0xff]  ;;  %v1450_v52 = vld [vmem:[%s3213_s2 + $0x50] sm:$0xff] }
 0x141   :  { %v1383_v57 = vld [vmem:[#allocation2 + $0x38] sm:$0xff] }
 0x142   :  { %v1607_v58 = vmax.f32 %v1543_v54, 0.0  ;;  %v1511_v59 = vadd.f32 %v1447_v53, %v1383_v57  ;;  %1317 = vst.msk [vmem:[#allocation2 + $0x40] sm:$0xff] %vm18_vm14, %v1252_v55  ;;  %v966_v60 = vpop.f32.mrf.mxu2  ;;  %v240_v55 = vpop.permute.xlu0 %239 }
 0x143   :  { %v1175_v63 = vpop.f32.mrf.mxu3  ;;  %vm402_vm8 = vcmp.eq.s32.totalorder %v2239_v12, %v240_v55 }
 0x144   :  { %1671 = vst.msk [vmem:[%s3214_s3 + $0x138] sm:$0xff] %vm18_vm14, %v1607_v58  ;;  %v1575_v0 = vmax.f32 %v1511_v59, 0.0  ;;  %v1176_v1 = vadd.f32 %v1175_v63, %v966_v60  ;;  %v870_v2 = vpop.f32.mrf.mxu0  ;;  %v339_v60 = vpop.permute.xlu1 %338 }
 0x145   :  { %v1079_v5 = vpop.f32.mrf.mxu1  ;;  %vm468_vm7 = vcmp.eq.s32.totalorder %v2239_v12, %v339_v60  ;;  %vm469_vm9 = vcmp.eq.s32.totalorder %v2251_v16, %v339_v60 }
 0x146   :  { %1639 = vst.msk [vmem:[%s3214_s3 + $0x38] sm:$0xff] %vm18_vm14, %v1575_v0  ;;  %v1285_v6 = vadd.f32 %v1176_v1, %v771_v62  ;;  %v1080_v7 = vadd.f32 %v1079_v5, %v870_v2  ;;  %v1483_v2 = vld [vmem:[%s3213_s2 + $0x158] sm:$0xff] }
 0x147   :  { %v1416_v8 = vld [vmem:[#allocation2 + $0x140] sm:$0xff]  ;;  %1853 = vmatmul.msk.f32.gmra.mxu0 %vm396_vm11, %v1995_v18  ;;  %1886 = vmatmul.msk.f32.gmra.mxu2 %vm462_vm10, %v1995_v18  ;;  %vm403_vm10 = vcmp.eq.s32.totalorder %v2251_v16, %v240_v55 }
 0x148   :  { %v1544_v10 = vadd.f32 %v1480_v3, %v1416_v8  ;;  %1350 = vst.msk [vmem:[#allocation2 + $0x148] sm:$0xff] %vm18_vm14, %v1285_v6  ;;  %v1253_v11 = vadd.f32 %v1080_v7, %v739_v4  ;;  %1917 = vmatmul.msk.f32.gmra.mxu1 %vm397_vm13, %v1995_v18  ;;  %1950 = vmatmul.msk.f32.gmra.mxu3 %vm463_vm12, %v1995_v18  ;;  %v742_v3 = vld [vmem:[#allocation2 + $0x60] sm:$0xff]  ;;  %v1451_v8 = vld [vmem:[%s3213_s2 + $0x58] sm:$0xff] }
 0x149   :  { %v1384_v14 = vld [vmem:[#allocation2 + $0x40] sm:$0xff] }
 0x14a   :  { %v1608_v15 = vmax.f32 %v1544_v10, 0.0  ;;  %v1512_v17 = vadd.f32 %v1448_v9, %v1384_v14  ;;  %1318 = vst.msk [vmem:[#allocation2 + $0x48] sm:$0xff] %vm18_vm14, %v1253_v11  ;;  %v969_v19 = vpop.f32.mrf.mxu2  ;;  %v243_v9 = vpop.permute.xlu2 %242 }
 0x14b   :  { %v1178_v22 = vpop.f32.mrf.mxu3  ;;  %vm404_vm11 = vcmp.eq.s32.totalorder %v2239_v12, %v243_v9  ;;  %vm405_vm13 = vcmp.eq.s32.totalorder %v2251_v16, %v243_v9 }
 0x14c   :  { %1672 = vst.msk [vmem:[%s3214_s3 + $0x140] sm:$0xff] %vm18_vm14, %v1608_v15  ;;  %v1576_v23 = vmax.f32 %v1512_v17, 0.0  ;;  %v1179_v24 = vadd.f32 %v1178_v22, %v969_v19  ;;  %v873_v25 = vpop.f32.mrf.mxu0  ;;  %v342_v19 = vpop.permute.xlu0 %341 }
 0x14d   :  { %v1082_v28 = vpop.f32.mrf.mxu1  ;;  %vm470_vm12 = vcmp.eq.s32.totalorder %v2239_v12, %v342_v19 }
 0x14e   :  { %1640 = vst.msk [vmem:[%s3214_s3 + $0x40] sm:$0xff] %vm18_vm14, %v1576_v23  ;;  %v1286_v29 = vadd.f32 %v1179_v24, %v772_v21  ;;  %v1083_v30 = vadd.f32 %v1082_v28, %v873_v25  ;;  %v1484_v25 = vld [vmem:[%s3213_s2 + $0x160] sm:$0xff] }
 0x14f   :  { %v1417_v31 = vld [vmem:[#allocation2 + $0x148] sm:$0xff]  ;;  %1854 = vmatmul.msk.f32.gmra.mxu0 %vm398_vm15, %v1995_v18  ;;  %1887 = vmatmul.msk.f32.gmra.mxu2 %vm464_vm0, %v1995_v18  ;;  %vm471_vm15 = vcmp.eq.s32.totalorder %v2251_v16, %v342_v19  ;;  %v746_v19 = vld [vmem:[#allocation2 + $0x80] sm:$0xff] }
 0x150   :  { %v1545_v33 = vadd.f32 %v1481_v26, %v1417_v31  ;;  %1351 = vst.msk [vmem:[#allocation2 + $0x150] sm:$0xff] %vm18_vm14, %v1286_v29  ;;  %v1254_v34 = vadd.f32 %v1083_v30, %v740_v27  ;;  %1918 = vmatmul.msk.f32.gmra.mxu1 %vm399_vm1, %v1995_v18  ;;  %1951 = vmatmul.msk.f32.gmra.mxu3 %vm465_vm2, %v1995_v18  ;;  %v743_v26 = vld [vmem:[#allocation2 + $0x68] sm:$0xff]  ;;  %v1452_v31 = vld [vmem:[%s3213_s2 + $0x60] sm:$0xff] }
 0x151   :  { %v1385_v36 = vld [vmem:[#allocation2 + $0x48] sm:$0xff] }
 0x152   :  { %v1609_v37 = vmax.f32 %v1545_v33, 0.0  ;;  %v1513_v38 = vadd.f32 %v1449_v32, %v1385_v36  ;;  %1319 = vst.msk [vmem:[#allocation2 + $0x50] sm:$0xff] %vm18_vm14, %v1254_v34  ;;  %v972_v39 = vpop.f32.mrf.mxu2  ;;  %v345_v35 = vpop.permute.xlu2 %344 }
 0x153   :  { %v1181_v42 = vpop.f32.mrf.mxu3  ;;  %vm472_vm0 = vcmp.eq.s32.totalorder %v2239_v12, %v345_v35  ;;  %vm473_vm2 = vcmp.eq.s32.totalorder %v2251_v16, %v345_v35 }
 0x154   :  { %1673 = vst.msk [vmem:[%s3214_s3 + $0x148] sm:$0xff] %vm18_vm14, %v1609_v37  ;;  %v1577_v43 = vmax.f32 %v1513_v38, 0.0  ;;  %v1182_v44 = vadd.f32 %v1181_v42, %v972_v39  ;;  %v876_v45 = vpop.f32.mrf.mxu0  ;;  %v246_v39 = vpop.permute.xlu1 %245 }
 0x155   :  { %v1085_v48 = vpop.f32.mrf.mxu1  ;;  %vm406_vm1 = vcmp.eq.s32.totalorder %v2239_v12, %v246_v39 }
 0x156   :  { %1641 = vst.msk [vmem:[%s3214_s3 + $0x48] sm:$0xff] %vm18_vm14, %v1577_v43  ;;  %v1287_v49 = vadd.f32 %v1182_v44, %v773_v41  ;;  %v1086_v50 = vadd.f32 %v1085_v48, %v876_v45  ;;  %v1485_v45 = vld [vmem:[%s3213_s2 + $0x168] sm:$0xff] }
 0x157   :  { %v1418_v51 = vld [vmem:[#allocation2 + $0x150] sm:$0xff]  ;;  %1855 = vmatmul.msk.f32.gmra.mxu0 %vm400_vm4, %v1995_v18  ;;  %1888 = vmatmul.msk.f32.gmra.mxu2 %vm466_vm3, %v1995_v18  ;;  %vm407_vm3 = vcmp.eq.s32.totalorder %v2251_v16, %v246_v39 }
 0x158   :  { %v1546_v53 = vadd.f32 %v1482_v46, %v1418_v51  ;;  %1352 = vst.msk [vmem:[#allocation2 + $0x158] sm:$0xff] %vm18_vm14, %v1287_v49  ;;  %v1255_v54 = vadd.f32 %v1086_v50, %v741_v47  ;;  %1919 = vmatmul.msk.f32.gmra.mxu1 %vm401_vm6, %v1995_v18  ;;  %1952 = vmatmul.msk.f32.gmra.mxu3 %vm467_vm5, %v1995_v18  ;;  %v744_v46 = vld [vmem:[#allocation2 + $0x70] sm:$0xff]  ;;  %v1453_v51 = vld [vmem:[%s3213_s2 + $0x68] sm:$0xff] }
 0x159   :  { %v1386_v56 = vld [vmem:[#allocation2 + $0x50] sm:$0xff] }
 0x15a   :  { %v1610_v57 = vmax.f32 %v1546_v53, 0.0  ;;  %v1514_v58 = vadd.f32 %v1450_v52, %v1386_v56  ;;  %1320 = vst.msk [vmem:[#allocation2 + $0x58] sm:$0xff] %vm18_vm14, %v1255_v54  ;;  %v975_v59 = vpop.f32.mrf.mxu2 }
 0x15b   :  { %v1184_v62 = vpop.f32.mrf.mxu3 }
 0x15c   :  { %1674 = vst.msk [vmem:[%s3214_s3 + $0x150] sm:$0xff] %vm18_vm14, %v1610_v57  ;;  %v1578_v63 = vmax.f32 %v1514_v58, 0.0  ;;  %v1185_v0 = vadd.f32 %v1184_v62, %v975_v59  ;;  %v879_v1 = vpop.f32.mrf.mxu0  ;;  %v249_v58 = vpop.permute.xlu0 %248  ;;  %v777_v59 = vld [vmem:[#allocation2 + $0x178] sm:$0xff] }
 0x15d   :  { %v1088_v4 = vpop.f32.mrf.mxu1  ;;  %vm408_vm4 = vcmp.eq.s32.totalorder %v2239_v12, %v249_v58  ;;  %vm409_vm5 = vcmp.eq.s32.totalorder %v2251_v16, %v249_v58  ;;  %v778_v16 = vld [vmem:[#allocation2 + $0x180] sm:$0xff] }
 0x15e   :  { %1642 = vst.msk [vmem:[%s3214_s3 + $0x50] sm:$0xff] %vm18_vm14, %v1578_v63  ;;  %v1288_v5 = vadd.f32 %v1185_v0, %v774_v61  ;;  %v1089_v6 = vadd.f32 %v1088_v4, %v879_v1  ;;  %v1486_v0 = vld [vmem:[%s3213_s2 + $0x170] sm:$0xff]  ;;  %v745_v1 = vld [vmem:[#allocation2 + $0x78] sm:$0xff] }
 0x15f   :  { %v1419_v7 = vld [vmem:[#allocation2 + $0x158] sm:$0xff]  ;;  %1856 = vmatmul.msk.f32.gmra.mxu0 %vm402_vm8, %v1995_v18  ;;  %1889 = vmatmul.msk.f32.gmra.mxu2 %vm468_vm7, %v1995_v18 }
 0x160   :  { %v1547_v10 = vadd.f32 %v1483_v2, %v1419_v7  ;;  %1353 = vst.msk [vmem:[#allocation2 + $0x160] sm:$0xff] %vm18_vm14, %v1288_v5  ;;  %v1256_v11 = vadd.f32 %v1089_v6, %v742_v3  ;;  %1920 = vmatmul.msk.f32.gmra.mxu1 %vm403_vm10, %v1995_v18  ;;  %1953 = vmatmul.msk.f32.gmra.mxu3 %vm469_vm9, %v1995_v18  ;;  %v1454_v6 = vld [vmem:[%s3213_s2 + $0x70] sm:$0xff] }
 0x161   :  { %v1387_v13 = vld [vmem:[#allocation2 + $0x58] sm:$0xff] }
 0x162   :  { %v1611_v14 = vmax.f32 %v1547_v10, 0.0  ;;  %v1515_v15 = vadd.f32 %v1451_v8, %v1387_v13  ;;  %1321 = vst.msk [vmem:[#allocation2 + $0x60] sm:$0xff] %vm18_vm14, %v1256_v11  ;;  %v978_v17 = vpop.f32.mrf.mxu2 }
 0x163   :  { %v1187_v21 = vpop.f32.mrf.mxu3 }
 0x164   :  { %1675 = vst.msk [vmem:[%s3214_s3 + $0x158] sm:$0xff] %vm18_vm14, %v1611_v14  ;;  %v1579_v22 = vmax.f32 %v1515_v15, 0.0  ;;  %v1188_v23 = vadd.f32 %v1187_v21, %v978_v17  ;;  %v882_v24 = vpop.f32.mrf.mxu0 }
 0x165   :  { %v1091_v27 = vpop.f32.mrf.mxu1 }
 0x166   :  { %1643 = vst.msk [vmem:[%s3214_s3 + $0x58] sm:$0xff] %vm18_vm14, %v1579_v22  ;;  %v1289_v28 = vadd.f32 %v1188_v23, %v775_v20  ;;  %v1092_v29 = vadd.f32 %v1091_v27, %v882_v24  ;;  %v1455_v24 = vld [vmem:[%s3213_s2 + $0x78] sm:$0xff] }
 0x167   :  { %v1420_v30 = vld [vmem:[#allocation2 + $0x160] sm:$0xff]  ;;  %1857 = vmatmul.msk.f32.gmra.mxu0 %vm404_vm11, %v1995_v18  ;;  %1890 = vmatmul.msk.f32.gmra.mxu2 %vm470_vm12, %v1995_v18 }
 0x168   :  { %v1548_v32 = vadd.f32 %v1484_v25, %v1420_v30  ;;  %1354 = vst.msk [vmem:[#allocation2 + $0x168] sm:$0xff] %vm18_vm14, %v1289_v28  ;;  %v1257_v33 = vadd.f32 %v1092_v29, %v743_v26  ;;  %1921 = vmatmul.msk.f32.gmra.mxu1 %vm405_vm13, %v1995_v18  ;;  %1954 = vmatmul.msk.f32.gmra.mxu3 %vm471_vm15, %v1995_v18 }
 0x169   :  { %v1388_v34 = vld [vmem:[#allocation2 + $0x60] sm:$0xff] }
 0x16a   :  { %v1612_v36 = vmax.f32 %v1548_v32, 0.0  ;;  %v1516_v37 = vadd.f32 %v1452_v31, %v1388_v34  ;;  %1322 = vst.msk [vmem:[#allocation2 + $0x68] sm:$0xff] %vm18_vm14, %v1257_v33  ;;  %v981_v38 = vpop.f32.mrf.mxu2  ;;  %v779_v31 = vld [vmem:[#allocation2 + $0x188] sm:$0xff] }
 0x16b   :  { %v1190_v41 = vpop.f32.mrf.mxu3 }
 0x16c   :  { %1676 = vst.msk [vmem:[%s3214_s3 + $0x160] sm:$0xff] %vm18_vm14, %v1612_v36  ;;  %v1580_v42 = vmax.f32 %v1516_v37, 0.0  ;;  %v1191_v43 = vadd.f32 %v1190_v41, %v981_v38  ;;  %v885_v44 = vpop.f32.mrf.mxu0  ;;  %v1488_v36 = vld [vmem:[%s3213_s2 + $0x180] sm:$0xff]  ;;  %v747_v37 = vld [vmem:[#allocation2 + $0x88] sm:$0xff] }
 0x16d   :  { %v1094_v47 = vpop.f32.mrf.mxu1 }
 0x16e   :  { %1644 = vst.msk [vmem:[%s3214_s3 + $0x60] sm:$0xff] %vm18_vm14, %v1580_v42  ;;  %v1290_v48 = vadd.f32 %v1191_v43, %v776_v40  ;;  %v1095_v49 = vadd.f32 %v1094_v47, %v885_v44  ;;  %v1456_v42 = vld [vmem:[%s3213_s2 + $0x80] sm:$0xff] }
 0x16f   :  { %v1421_v50 = vld [vmem:[#allocation2 + $0x168] sm:$0xff]  ;;  %1858 = vmatmul.msk.f32.gmra.mxu0 %vm406_vm1, %v1995_v18  ;;  %1891 = vmatmul.msk.f32.gmra.mxu2 %vm472_vm0, %v1995_v18 }
 0x170   :  { %v1549_v52 = vadd.f32 %v1485_v45, %v1421_v50  ;;  %1355 = vst.msk [vmem:[#allocation2 + $0x170] sm:$0xff] %vm18_vm14, %v1290_v48  ;;  %v1258_v53 = vadd.f32 %v1095_v49, %v744_v46  ;;  %1922 = vmatmul.msk.f32.gmra.mxu1 %vm407_vm3, %v1995_v18  ;;  %1955 = vmatmul.msk.f32.gmra.mxu3 %vm473_vm2, %v1995_v18  ;;  %v780_v49 = vld [vmem:[#allocation2 + $0x190] sm:$0xff] }
 0x171   :  { %v1389_v54 = vld [vmem:[#allocation2 + $0x68] sm:$0xff] }
 0x172   :  { %v1613_v55 = vmax.f32 %v1549_v52, 0.0  ;;  %v1517_v56 = vadd.f32 %v1453_v51, %v1389_v54  ;;  %1323 = vst.msk [vmem:[#allocation2 + $0x70] sm:$0xff] %vm18_vm14, %v1258_v53  ;;  %v984_v57 = vpop.f32.mrf.mxu2  ;;  %v1489_v54 = vld [vmem:[%s3213_s2 + $0x188] sm:$0xff] }
 0x173   :  { %v1193_v60 = vpop.f32.mrf.mxu3 }
 0x174   :  { %1677 = vst.msk [vmem:[%s3214_s3 + $0x168] sm:$0xff] %vm18_vm14, %v1613_v55  ;;  %v1581_v61 = vmax.f32 %v1517_v56, 0.0  ;;  %v1194_v62 = vadd.f32 %v1193_v60, %v984_v57  ;;  %v888_v63 = vpop.f32.mrf.mxu0  ;;  %v748_v55 = vld [vmem:[#allocation2 + $0x90] sm:$0xff]  ;;  %v1457_v60 = vld [vmem:[%s3213_s2 + $0x88] sm:$0xff] }
 0x175   :  { %v1097_v2 = vpop.f32.mrf.mxu1 }
 0x176   :  { %1645 = vst.msk [vmem:[%s3214_s3 + $0x68] sm:$0xff] %vm18_vm14, %v1581_v61  ;;  %v1291_v3 = vadd.f32 %v1194_v62, %v777_v59  ;;  %v1098_v4 = vadd.f32 %v1097_v2, %v888_v63 }
 0x177   :  { %v1422_v5 = vld [vmem:[#allocation2 + $0x170] sm:$0xff]  ;;  %1859 = vmatmul.msk.f32.gmra.mxu0 %vm408_vm4, %v1995_v18 }
 0x178   :  { %v1550_v7 = vadd.f32 %v1486_v0, %v1422_v5  ;;  %1356 = vst.msk [vmem:[#allocation2 + $0x178] sm:$0xff] %vm18_vm14, %v1291_v3  ;;  %v1259_v12 = vadd.f32 %v1098_v4, %v745_v1  ;;  %1923 = vmatmul.msk.f32.gmra.mxu1 %vm409_vm5, %v1995_v18  ;;  %v1487_v18 = vld [vmem:[%s3213_s2 + $0x178] sm:$0xff] }
 0x179   :  { %v1390_v8 = vld [vmem:[#allocation2 + $0x70] sm:$0xff]  ;;  %v781_v3 = vld [vmem:[#allocation2 + $0x198] sm:$0xff] }
 0x17a   :  { %v1614_v9 = vmax.f32 %v1550_v7, 0.0  ;;  %v1518_v10 = vadd.f32 %v1454_v6, %v1390_v8  ;;  %1324 = vst.msk [vmem:[#allocation2 + $0x78] sm:$0xff] %vm18_vm14, %v1259_v12  ;;  %v987_v11 = vpop.f32.mrf.mxu2  ;;  %v1490_v12 = vld [vmem:[%s3213_s2 + $0x190] sm:$0xff]  ;;  %v749_v8 = vld [vmem:[#allocation2 + $0x98] sm:$0xff] }
 0x17b   :  { %v1196_v13 = vpop.f32.mrf.mxu3 }
 0x17c   :  { %1678 = vst.msk [vmem:[%s3214_s3 + $0x170] sm:$0xff] %vm18_vm14, %v1614_v9  ;;  %v1582_v14 = vmax.f32 %v1518_v10, 0.0  ;;  %v1197_v15 = vadd.f32 %v1196_v13, %v987_v11  ;;  %v891_v17 = vpop.f32.mrf.mxu0  ;;  %v1458_v13 = vld [vmem:[%s3213_s2 + $0x90] sm:$0xff] }
 0x17d   :  { %v1100_v20 = vpop.f32.mrf.mxu1 }
 0x17e   :  { %1646 = vst.msk [vmem:[%s3214_s3 + $0x70] sm:$0xff] %vm18_vm14, %v1582_v14  ;;  %v1292_v21 = vadd.f32 %v1197_v15, %v778_v16  ;;  %v1101_v22 = vadd.f32 %v1100_v20, %v891_v17 }
 0x17f   :  { %v1423_v23 = vld [vmem:[#allocation2 + $0x178] sm:$0xff] }
 0x180   :  { %v1551_v25 = vadd.f32 %v1487_v18, %v1423_v23  ;;  %1357 = vst.msk [vmem:[#allocation2 + $0x180] sm:$0xff] %vm18_vm14, %v1292_v21  ;;  %v1260_v26 = vadd.f32 %v1101_v22, %v746_v19  ;;  %v782_v21 = vld [vmem:[#allocation2 + $0x1a0] sm:$0xff] }
 0x181   :  { %v1391_v27 = vld [vmem:[#allocation2 + $0x78] sm:$0xff] }
 0x182   :  { %v1615_v28 = vmax.f32 %v1551_v25, 0.0  ;;  %v1519_v29 = vadd.f32 %v1455_v24, %v1391_v27  ;;  %1325 = vst.msk [vmem:[#allocation2 + $0x80] sm:$0xff] %vm18_vm14, %v1260_v26  ;;  %v990_v30 = vpop.f32.mrf.mxu2  ;;  %v1491_v26 = vld [vmem:[%s3213_s2 + $0x198] sm:$0xff]  ;;  %v750_v27 = vld [vmem:[#allocation2 + $0xa0] sm:$0xff] }
 0x183   :  { %v1199_v32 = vpop.f32.mrf.mxu3 }
 0x184   :  { %1679 = vst.msk [vmem:[%s3214_s3 + $0x178] sm:$0xff] %vm18_vm14, %v1615_v28  ;;  %v1583_v33 = vmax.f32 %v1519_v29, 0.0  ;;  %v1200_v34 = vadd.f32 %v1199_v32, %v990_v30  ;;  %v894_v35 = vpop.f32.mrf.mxu0  ;;  %v1459_v32 = vld [vmem:[%s3213_s2 + $0x98] sm:$0xff] }
 0x185   :  { %v1103_v38 = vpop.f32.mrf.mxu1 }
 0x186   :  { %1647 = vst.msk [vmem:[%s3214_s3 + $0x78] sm:$0xff] %vm18_vm14, %v1583_v33  ;;  %v1293_v39 = vadd.f32 %v1200_v34, %v779_v31  ;;  %v1104_v40 = vadd.f32 %v1103_v38, %v894_v35 }
 0x187   :  { %v1424_v41 = vld [vmem:[#allocation2 + $0x180] sm:$0xff] }
 0x188   :  { %v1552_v43 = vadd.f32 %v1488_v36, %v1424_v41  ;;  %1358 = vst.msk [vmem:[#allocation2 + $0x188] sm:$0xff] %vm18_vm14, %v1293_v39  ;;  %v1261_v44 = vadd.f32 %v1104_v40, %v747_v37  ;;  %v783_v39 = vld [vmem:[#allocation2 + $0x1a8] sm:$0xff] }
 0x189   :  { %v1392_v45 = vld [vmem:[#allocation2 + $0x80] sm:$0xff] }
 0x18a   :  { %v1616_v46 = vmax.f32 %v1552_v43, 0.0  ;;  %v1520_v47 = vadd.f32 %v1456_v42, %v1392_v45  ;;  %1326 = vst.msk [vmem:[#allocation2 + $0x88] sm:$0xff] %vm18_vm14, %v1261_v44  ;;  %v993_v48 = vpop.f32.mrf.mxu2  ;;  %v1492_v44 = vld [vmem:[%s3213_s2 + $0x1a0] sm:$0xff]  ;;  %v751_v45 = vld [vmem:[#allocation2 + $0xa8] sm:$0xff] }
 0x18b   :  { %v1202_v50 = vpop.f32.mrf.mxu3 }
 0x18c   :  { %1680 = vst.msk [vmem:[%s3214_s3 + $0x180] sm:$0xff] %vm18_vm14, %v1616_v46  ;;  %v1584_v51 = vmax.f32 %v1520_v47, 0.0  ;;  %v1203_v52 = vadd.f32 %v1202_v50, %v993_v48  ;;  %v897_v53 = vpop.f32.mrf.mxu0  ;;  %v1460_v50 = vld [vmem:[%s3213_s2 + $0xa0] sm:$0xff] }
 0x18d   :  { %v1106_v56 = vpop.f32.mrf.mxu1 }
 0x18e   :  { %1648 = vst.msk [vmem:[%s3214_s3 + $0x80] sm:$0xff] %vm18_vm14, %v1584_v51  ;;  %v1294_v57 = vadd.f32 %v1203_v52, %v780_v49  ;;  %v1107_v58 = vadd.f32 %v1106_v56, %v897_v53 }
 0x18f   :  { %v1425_v59 = vld [vmem:[#allocation2 + $0x188] sm:$0xff] }
 0x190   :  { %v1553_v61 = vadd.f32 %v1489_v54, %v1425_v59  ;;  %1359 = vst.msk [vmem:[#allocation2 + $0x190] sm:$0xff] %vm18_vm14, %v1294_v57  ;;  %v1262_v62 = vadd.f32 %v1107_v58, %v748_v55  ;;  %v784_v57 = vld [vmem:[#allocation2 + $0x1b0] sm:$0xff] }
 0x191   :  { %v1393_v63 = vld [vmem:[#allocation2 + $0x88] sm:$0xff] }
 0x192   :  { %v1617_v0 = vmax.f32 %v1553_v61, 0.0  ;;  %v1521_v1 = vadd.f32 %v1457_v60, %v1393_v63  ;;  %1327 = vst.msk [vmem:[#allocation2 + $0x90] sm:$0xff] %vm18_vm14, %v1262_v62  ;;  %v996_v2 = vpop.f32.mrf.mxu2  ;;  %v1493_v62 = vld [vmem:[%s3213_s2 + $0x1a8] sm:$0xff]  ;;  %v752_v63 = vld [vmem:[#allocation2 + $0xb0] sm:$0xff] }
 0x193   :  { %v1205_v4 = vpop.f32.mrf.mxu3 }
 0x194   :  { %1681 = vst.msk [vmem:[%s3214_s3 + $0x188] sm:$0xff] %vm18_vm14, %v1617_v0  ;;  %v1585_v5 = vmax.f32 %v1521_v1, 0.0  ;;  %v1206_v6 = vadd.f32 %v1205_v4, %v996_v2  ;;  %v900_v7 = vpop.f32.mrf.mxu0  ;;  %v1461_v4 = vld [vmem:[%s3213_s2 + $0xa8] sm:$0xff] }
 0x195   :  { %v1109_v9 = vpop.f32.mrf.mxu1 }
 0x196   :  { %1649 = vst.msk [vmem:[%s3214_s3 + $0x88] sm:$0xff] %vm18_vm14, %v1585_v5  ;;  %v1295_v10 = vadd.f32 %v1206_v6, %v781_v3  ;;  %v1110_v11 = vadd.f32 %v1109_v9, %v900_v7 }
 0x197   :  { %v1426_v16 = vld [vmem:[#allocation2 + $0x190] sm:$0xff] }
 0x198   :  { %v1554_v14 = vadd.f32 %v1490_v12, %v1426_v16  ;;  %1360 = vst.msk [vmem:[#allocation2 + $0x198] sm:$0xff] %vm18_vm14, %v1295_v10  ;;  %v1263_v15 = vadd.f32 %v1110_v11, %v749_v8  ;;  %v785_v10 = vld [vmem:[#allocation2 + $0x1b8] sm:$0xff] }
 0x199   :  { %v1394_v17 = vld [vmem:[#allocation2 + $0x90] sm:$0xff] }
 0x19a   :  { %v1618_v18 = vmax.f32 %v1554_v14, 0.0  ;;  %v1522_v19 = vadd.f32 %v1458_v13, %v1394_v17  ;;  %1328 = vst.msk [vmem:[#allocation2 + $0x98] sm:$0xff] %vm18_vm14, %v1263_v15  ;;  %v999_v20 = vpop.f32.mrf.mxu2  ;;  %v1494_v15 = vld [vmem:[%s3213_s2 + $0x1b0] sm:$0xff]  ;;  %v753_v17 = vld [vmem:[#allocation2 + $0xb8] sm:$0xff] }
 0x19b   :  { %v1208_v22 = vpop.f32.mrf.mxu3 }
 0x19c   :  { %1682 = vst.msk [vmem:[%s3214_s3 + $0x190] sm:$0xff] %vm18_vm14, %v1618_v18  ;;  %v1586_v23 = vmax.f32 %v1522_v19, 0.0  ;;  %v1209_v24 = vadd.f32 %v1208_v22, %v999_v20  ;;  %v903_v25 = vpop.f32.mrf.mxu0  ;;  %v1462_v22 = vld [vmem:[%s3213_s2 + $0xb0] sm:$0xff] }
 0x19d   :  { %v1112_v28 = vpop.f32.mrf.mxu1 }
 0x19e   :  { %1650 = vst.msk [vmem:[%s3214_s3 + $0x90] sm:$0xff] %vm18_vm14, %v1586_v23  ;;  %v1296_v29 = vadd.f32 %v1209_v24, %v782_v21  ;;  %v1113_v30 = vadd.f32 %v1112_v28, %v903_v25 }
 0x19f   :  { %v1427_v31 = vld [vmem:[#allocation2 + $0x198] sm:$0xff] }
 0x1a0   :  { %v1555_v33 = vadd.f32 %v1491_v26, %v1427_v31  ;;  %1361 = vst.msk [vmem:[#allocation2 + $0x1a0] sm:$0xff] %vm18_vm14, %v1296_v29  ;;  %v1264_v34 = vadd.f32 %v1113_v30, %v750_v27  ;;  %v786_v29 = vld [vmem:[#allocation2 + $0x1c0] sm:$0xff] }
 0x1a1   :  { %v1395_v35 = vld [vmem:[#allocation2 + $0x98] sm:$0xff] }
 0x1a2   :  { %v1619_v36 = vmax.f32 %v1555_v33, 0.0  ;;  %v1523_v37 = vadd.f32 %v1459_v32, %v1395_v35  ;;  %1329 = vst.msk [vmem:[#allocation2 + $0xa0] sm:$0xff] %vm18_vm14, %v1264_v34  ;;  %v1002_v38 = vpop.f32.mrf.mxu2  ;;  %v1495_v34 = vld [vmem:[%s3213_s2 + $0x1b8] sm:$0xff]  ;;  %v754_v35 = vld [vmem:[#allocation2 + $0xc0] sm:$0xff] }
 0x1a3   :  { %v1211_v40 = vpop.f32.mrf.mxu3 }
 0x1a4   :  { %1683 = vst.msk [vmem:[%s3214_s3 + $0x198] sm:$0xff] %vm18_vm14, %v1619_v36  ;;  %v1587_v41 = vmax.f32 %v1523_v37, 0.0  ;;  %v1212_v42 = vadd.f32 %v1211_v40, %v1002_v38  ;;  %v906_v43 = vpop.f32.mrf.mxu0  ;;  %v1463_v40 = vld [vmem:[%s3213_s2 + $0xb8] sm:$0xff] }
 0x1a5   :  { %v1115_v46 = vpop.f32.mrf.mxu1 }
 0x1a6   :  { %1651 = vst.msk [vmem:[%s3214_s3 + $0x98] sm:$0xff] %vm18_vm14, %v1587_v41  ;;  %v1297_v47 = vadd.f32 %v1212_v42, %v783_v39  ;;  %v1116_v48 = vadd.f32 %v1115_v46, %v906_v43 }
 0x1a7   :  { %v1428_v49 = vld [vmem:[#allocation2 + $0x1a0] sm:$0xff] }
 0x1a8   :  { %v1556_v51 = vadd.f32 %v1492_v44, %v1428_v49  ;;  %1362 = vst.msk [vmem:[#allocation2 + $0x1a8] sm:$0xff] %vm18_vm14, %v1297_v47  ;;  %v1265_v52 = vadd.f32 %v1116_v48, %v751_v45  ;;  %v787_v47 = vld [vmem:[#allocation2 + $0x1c8] sm:$0xff] }
 0x1a9   :  { %v1396_v53 = vld [vmem:[#allocation2 + $0xa0] sm:$0xff] }
 0x1aa   :  { %v1620_v54 = vmax.f32 %v1556_v51, 0.0  ;;  %v1524_v55 = vadd.f32 %v1460_v50, %v1396_v53  ;;  %1330 = vst.msk [vmem:[#allocation2 + $0xa8] sm:$0xff] %vm18_vm14, %v1265_v52  ;;  %v1005_v56 = vpop.f32.mrf.mxu2  ;;  %v1496_v52 = vld [vmem:[%s3213_s2 + $0x1c0] sm:$0xff]  ;;  %v755_v53 = vld [vmem:[#allocation2 + $0xc8] sm:$0xff] }
 0x1ab   :  { %v1214_v58 = vpop.f32.mrf.mxu3 }
 0x1ac   :  { %1684 = vst.msk [vmem:[%s3214_s3 + $0x1a0] sm:$0xff] %vm18_vm14, %v1620_v54  ;;  %v1588_v59 = vmax.f32 %v1524_v55, 0.0  ;;  %v1215_v60 = vadd.f32 %v1214_v58, %v1005_v56  ;;  %v909_v61 = vpop.f32.mrf.mxu0  ;;  %v1464_v58 = vld [vmem:[%s3213_s2 + $0xc0] sm:$0xff] }
 0x1ad   :  { %v1118_v0 = vpop.f32.mrf.mxu1 }
 0x1ae   :  { %1652 = vst.msk [vmem:[%s3214_s3 + $0xa0] sm:$0xff] %vm18_vm14, %v1588_v59  ;;  %v1298_v1 = vadd.f32 %v1215_v60, %v784_v57  ;;  %v1119_v2 = vadd.f32 %v1118_v0, %v909_v61 }
 0x1af   :  { %v1429_v3 = vld [vmem:[#allocation2 + $0x1a8] sm:$0xff] }
 0x1b0   :  { %v1557_v5 = vadd.f32 %v1493_v62, %v1429_v3  ;;  %1363 = vst.msk [vmem:[#allocation2 + $0x1b0] sm:$0xff] %vm18_vm14, %v1298_v1  ;;  %v1266_v6 = vadd.f32 %v1119_v2, %v752_v63  ;;  %v788_v1 = vld [vmem:[#allocation2 + $0x1d0] sm:$0xff] }
 0x1b1   :  { %v1397_v7 = vld [vmem:[#allocation2 + $0xa8] sm:$0xff] }
 0x1b2   :  { %v1621_v12 = vmax.f32 %v1557_v5, 0.0  ;;  %v1525_v8 = vadd.f32 %v1461_v4, %v1397_v7  ;;  %1331 = vst.msk [vmem:[#allocation2 + $0xb0] sm:$0xff] %vm18_vm14, %v1266_v6  ;;  %v1008_v9 = vpop.f32.mrf.mxu2  ;;  %v1497_v6 = vld [vmem:[%s3213_s2 + $0x1c8] sm:$0xff]  ;;  %v756_v7 = vld [vmem:[#allocation2 + $0xd0] sm:$0xff] }
 0x1b3   :  { %v1217_v11 = vpop.f32.mrf.mxu3 }
 0x1b4   :  { %1685 = vst.msk [vmem:[%s3214_s3 + $0x1a8] sm:$0xff] %vm18_vm14, %v1621_v12  ;;  %v1589_v16 = vmax.f32 %v1525_v8, 0.0  ;;  %v1218_v13 = vadd.f32 %v1217_v11, %v1008_v9  ;;  %v912_v14 = vpop.f32.mrf.mxu0  ;;  %v1465_v11 = vld [vmem:[%s3213_s2 + $0xc8] sm:$0xff] }
 0x1b5   :  { %v1121_v18 = vpop.f32.mrf.mxu1 }
 0x1b6   :  { %1653 = vst.msk [vmem:[%s3214_s3 + $0xa8] sm:$0xff] %vm18_vm14, %v1589_v16  ;;  %v1299_v19 = vadd.f32 %v1218_v13, %v785_v10  ;;  %v1122_v20 = vadd.f32 %v1121_v18, %v912_v14 }
 0x1b7   :  { %v1430_v21 = vld [vmem:[#allocation2 + $0x1b0] sm:$0xff] }
 0x1b8   :  { %v1558_v23 = vadd.f32 %v1494_v15, %v1430_v21  ;;  %1364 = vst.msk [vmem:[#allocation2 + $0x1b8] sm:$0xff] %vm18_vm14, %v1299_v19  ;;  %v1267_v24 = vadd.f32 %v1122_v20, %v753_v17  ;;  %v789_v19 = vld [vmem:[#allocation2 + $0x1d8] sm:$0xff] }
 0x1b9   :  { %v1398_v25 = vld [vmem:[#allocation2 + $0xb0] sm:$0xff] }
 0x1ba   :  { %v1622_v26 = vmax.f32 %v1558_v23, 0.0  ;;  %v1526_v27 = vadd.f32 %v1462_v22, %v1398_v25  ;;  %1332 = vst.msk [vmem:[#allocation2 + $0xb8] sm:$0xff] %vm18_vm14, %v1267_v24  ;;  %v1011_v28 = vpop.f32.mrf.mxu2  ;;  %v1498_v24 = vld [vmem:[%s3213_s2 + $0x1d0] sm:$0xff]  ;;  %v757_v25 = vld [vmem:[#allocation2 + $0xd8] sm:$0xff] }
 0x1bb   :  { %v1220_v30 = vpop.f32.mrf.mxu3 }
 0x1bc   :  { %1686 = vst.msk [vmem:[%s3214_s3 + $0x1b0] sm:$0xff] %vm18_vm14, %v1622_v26  ;;  %v1590_v31 = vmax.f32 %v1526_v27, 0.0  ;;  %v1221_v32 = vadd.f32 %v1220_v30, %v1011_v28  ;;  %v915_v33 = vpop.f32.mrf.mxu0  ;;  %v1466_v30 = vld [vmem:[%s3213_s2 + $0xd0] sm:$0xff] }
 0x1bd   :  { %v1124_v36 = vpop.f32.mrf.mxu1 }
 0x1be   :  { %1654 = vst.msk [vmem:[%s3214_s3 + $0xb0] sm:$0xff] %vm18_vm14, %v1590_v31  ;;  %v1300_v37 = vadd.f32 %v1221_v32, %v786_v29  ;;  %v1125_v38 = vadd.f32 %v1124_v36, %v915_v33 }
 0x1bf   :  { %v1431_v39 = vld [vmem:[#allocation2 + $0x1b8] sm:$0xff] }
 0x1c0   :  { %v1559_v41 = vadd.f32 %v1495_v34, %v1431_v39  ;;  %1365 = vst.msk [vmem:[#allocation2 + $0x1c0] sm:$0xff] %vm18_vm14, %v1300_v37  ;;  %v1268_v42 = vadd.f32 %v1125_v38, %v754_v35  ;;  %v790_v37 = vld [vmem:[#allocation2 + $0x1e0] sm:$0xff] }
 0x1c1   :  { %v1399_v43 = vld [vmem:[#allocation2 + $0xb8] sm:$0xff] }
 0x1c2   :  { %v1623_v44 = vmax.f32 %v1559_v41, 0.0  ;;  %v1527_v45 = vadd.f32 %v1463_v40, %v1399_v43  ;;  %1333 = vst.msk [vmem:[#allocation2 + $0xc0] sm:$0xff] %vm18_vm14, %v1268_v42  ;;  %v1014_v46 = vpop.f32.mrf.mxu2  ;;  %v1499_v42 = vld [vmem:[%s3213_s2 + $0x1d8] sm:$0xff]  ;;  %v758_v43 = vld [vmem:[#allocation2 + $0xe0] sm:$0xff] }
 0x1c3   :  { %v1223_v48 = vpop.f32.mrf.mxu3 }
 0x1c4   :  { %1687 = vst.msk [vmem:[%s3214_s3 + $0x1b8] sm:$0xff] %vm18_vm14, %v1623_v44  ;;  %v1591_v49 = vmax.f32 %v1527_v45, 0.0  ;;  %v1224_v50 = vadd.f32 %v1223_v48, %v1014_v46  ;;  %v918_v51 = vpop.f32.mrf.mxu0  ;;  %v1467_v48 = vld [vmem:[%s3213_s2 + $0xd8] sm:$0xff] }
 0x1c5   :  { %v1127_v54 = vpop.f32.mrf.mxu1 }
 0x1c6   :  { %1655 = vst.msk [vmem:[%s3214_s3 + $0xb8] sm:$0xff] %vm18_vm14, %v1591_v49  ;;  %v1301_v55 = vadd.f32 %v1224_v50, %v787_v47  ;;  %v1128_v56 = vadd.f32 %v1127_v54, %v918_v51 }
 0x1c7   :  { %v1432_v57 = vld [vmem:[#allocation2 + $0x1c0] sm:$0xff] }
 0x1c8   :  { %v1560_v59 = vadd.f32 %v1496_v52, %v1432_v57  ;;  %1366 = vst.msk [vmem:[#allocation2 + $0x1c8] sm:$0xff] %vm18_vm14, %v1301_v55  ;;  %v1269_v60 = vadd.f32 %v1128_v56, %v755_v53  ;;  %v791_v55 = vld [vmem:[#allocation2 + $0x1e8] sm:$0xff] }
 0x1c9   :  { %v1400_v61 = vld [vmem:[#allocation2 + $0xc0] sm:$0xff] }
 0x1ca   :  { %v1624_v62 = vmax.f32 %v1560_v59, 0.0  ;;  %v1528_v63 = vadd.f32 %v1464_v58, %v1400_v61  ;;  %1334 = vst.msk [vmem:[#allocation2 + $0xc8] sm:$0xff] %vm18_vm14, %v1269_v60  ;;  %v1017_v0 = vpop.f32.mrf.mxu2  ;;  %v1500_v60 = vld [vmem:[%s3213_s2 + $0x1e0] sm:$0xff]  ;;  %v759_v61 = vld [vmem:[#allocation2 + $0xe8] sm:$0xff] }
 0x1cb   :  { %v1226_v2 = vpop.f32.mrf.mxu3 }
 0x1cc   :  { %1688 = vst.msk [vmem:[%s3214_s3 + $0x1c0] sm:$0xff] %vm18_vm14, %v1624_v62  ;;  %v1592_v3 = vmax.f32 %v1528_v63, 0.0  ;;  %v1227_v4 = vadd.f32 %v1226_v2, %v1017_v0  ;;  %v921_v5 = vpop.f32.mrf.mxu0  ;;  %v1468_v2 = vld [vmem:[%s3213_s2 + $0xe0] sm:$0xff] }
 0x1cd   :  { %v1130_v12 = vpop.f32.mrf.mxu1 }
 0x1ce   :  { %1656 = vst.msk [vmem:[%s3214_s3 + $0xc0] sm:$0xff] %vm18_vm14, %v1592_v3  ;;  %v1302_v8 = vadd.f32 %v1227_v4, %v788_v1  ;;  %v1131_v9 = vadd.f32 %v1130_v12, %v921_v5 }
 0x1cf   :  { %v1433_v10 = vld [vmem:[#allocation2 + $0x1c8] sm:$0xff] }
 0x1d0   :  { %v1561_v16 = vadd.f32 %v1497_v6, %v1433_v10  ;;  %1367 = vst.msk [vmem:[#allocation2 + $0x1d0] sm:$0xff] %vm18_vm14, %v1302_v8  ;;  %v1270_v13 = vadd.f32 %v1131_v9, %v756_v7  ;;  %v792_v8 = vld [vmem:[#allocation2 + $0x1f0] sm:$0xff] }
 0x1d1   :  { %v1401_v14 = vld [vmem:[#allocation2 + $0xc8] sm:$0xff] }
 0x1d2   :  { %v1625_v15 = vmax.f32 %v1561_v16, 0.0  ;;  %v1529_v17 = vadd.f32 %v1465_v11, %v1401_v14  ;;  %1335 = vst.msk [vmem:[#allocation2 + $0xd0] sm:$0xff] %vm18_vm14, %v1270_v13  ;;  %v1020_v18 = vpop.f32.mrf.mxu2  ;;  %v1501_v13 = vld [vmem:[%s3213_s2 + $0x1e8] sm:$0xff]  ;;  %v760_v14 = vld [vmem:[#allocation2 + $0xf0] sm:$0xff] }
 0x1d3   :  { %v1229_v20 = vpop.f32.mrf.mxu3 }
 0x1d4   :  { %1689 = vst.msk [vmem:[%s3214_s3 + $0x1c8] sm:$0xff] %vm18_vm14, %v1625_v15  ;;  %v1593_v21 = vmax.f32 %v1529_v17, 0.0  ;;  %v1230_v22 = vadd.f32 %v1229_v20, %v1020_v18  ;;  %v924_v23 = vpop.f32.mrf.mxu0  ;;  %v1469_v20 = vld [vmem:[%s3213_s2 + $0xe8] sm:$0xff] }
 0x1d5   :  { %v1133_v26 = vpop.f32.mrf.mxu1 }
 0x1d6   :  { %1657 = vst.msk [vmem:[%s3214_s3 + $0xc8] sm:$0xff] %vm18_vm14, %v1593_v21  ;;  %v1303_v27 = vadd.f32 %v1230_v22, %v789_v19  ;;  %v1134_v28 = vadd.f32 %v1133_v26, %v924_v23 }
 0x1d7   :  { %v1434_v29 = vld [vmem:[#allocation2 + $0x1d0] sm:$0xff] }
 0x1d8   :  { %v1562_v31 = vadd.f32 %v1498_v24, %v1434_v29  ;;  %1368 = vst.msk [vmem:[#allocation2 + $0x1d8] sm:$0xff] %vm18_vm14, %v1303_v27  ;;  %v1271_v32 = vadd.f32 %v1134_v28, %v757_v25  ;;  %v793_v27 = vld [vmem:[#allocation2 + $0x1f8] sm:$0xff] }
 0x1d9   :  { %v1402_v33 = vld [vmem:[#allocation2 + $0xd0] sm:$0xff] }
 0x1da   :  { %v1626_v34 = vmax.f32 %v1562_v31, 0.0  ;;  %v1530_v35 = vadd.f32 %v1466_v30, %v1402_v33  ;;  %1336 = vst.msk [vmem:[#allocation2 + $0xd8] sm:$0xff] %vm18_vm14, %v1271_v32  ;;  %v1023_v36 = vpop.f32.mrf.mxu2  ;;  %v1502_v32 = vld [vmem:[%s3213_s2 + $0x1f0] sm:$0xff]  ;;  %v761_v33 = vld [vmem:[#allocation2 + $0xf8] sm:$0xff] }
 0x1db   :  { %v1232_v38 = vpop.f32.mrf.mxu3 }
 0x1dc   :  { %1690 = vst.msk [vmem:[%s3214_s3 + $0x1d0] sm:$0xff] %vm18_vm14, %v1626_v34  ;;  %v1594_v39 = vmax.f32 %v1530_v35, 0.0  ;;  %v1233_v40 = vadd.f32 %v1232_v38, %v1023_v36  ;;  %v927_v41 = vpop.f32.mrf.mxu0  ;;  %v1470_v38 = vld [vmem:[%s3213_s2 + $0xf0] sm:$0xff] }
 0x1dd   :  { %v1136_v44 = vpop.f32.mrf.mxu1 }
 0x1de   :  { %1658 = vst.msk [vmem:[%s3214_s3 + $0xd0] sm:$0xff] %vm18_vm14, %v1594_v39  ;;  %v1304_v45 = vadd.f32 %v1233_v40, %v790_v37  ;;  %v1137_v46 = vadd.f32 %v1136_v44, %v927_v41 }
 0x1df   :  { %v1435_v47 = vld [vmem:[#allocation2 + $0x1d8] sm:$0xff] }
 0x1e0   :  { %v1563_v49 = vadd.f32 %v1499_v42, %v1435_v47  ;;  %1369 = vst.msk [vmem:[#allocation2 + $0x1e0] sm:$0xff] %vm18_vm14, %v1304_v45  ;;  %v1272_v50 = vadd.f32 %v1137_v46, %v758_v43  ;;  %v1503_v45 = vld [vmem:[%s3213_s2 + $0x1f8] sm:$0xff] }
 0x1e1   :  { %v1403_v51 = vld [vmem:[#allocation2 + $0xd8] sm:$0xff] }
 0x1e2   :  { %v1627_v52 = vmax.f32 %v1563_v49, 0.0  ;;  %v1531_v53 = vadd.f32 %v1467_v48, %v1403_v51  ;;  %1337 = vst.msk [vmem:[#allocation2 + $0xe0] sm:$0xff] %vm18_vm14, %v1272_v50  ;;  %v1026_v54 = vpop.f32.mrf.mxu2  ;;  %v1471_v47 = vld [vmem:[%s3213_s2 + $0xf8] sm:$0xff] }
 0x1e3   :  { %v1235_v56 = vpop.f32.mrf.mxu3 }
 0x1e4   :  { %1691 = vst.msk [vmem:[%s3214_s3 + $0x1d8] sm:$0xff] %vm18_vm14, %v1627_v52  ;;  %v1595_v57 = vmax.f32 %v1531_v53, 0.0  ;;  %v1236_v58 = vadd.f32 %v1235_v56, %v1026_v54  ;;  %v930_v59 = vpop.f32.mrf.mxu0 }
 0x1e5   :  { %v1139_v62 = vpop.f32.mrf.mxu1 }
 0x1e6   :  { %1659 = vst.msk [vmem:[%s3214_s3 + $0xd8] sm:$0xff] %vm18_vm14, %v1595_v57  ;;  %v1305_v63 = vadd.f32 %v1236_v58, %v791_v55  ;;  %v1140_v0 = vadd.f32 %v1139_v62, %v930_v59 }
 0x1e7   :  { %v1436_v1 = vld [vmem:[#allocation2 + $0x1e0] sm:$0xff] }
 0x1e8   :  { %v1564_v3 = vadd.f32 %v1500_v60, %v1436_v1  ;;  %1370 = vst.msk [vmem:[#allocation2 + $0x1e8] sm:$0xff] %vm18_vm14, %v1305_v63  ;;  %v1273_v4 = vadd.f32 %v1140_v0, %v759_v61 }
 0x1e9   :  { %v1404_v5 = vld [vmem:[#allocation2 + $0xe0] sm:$0xff] }
 0x1ea   :  { %v1628_v6 = vmax.f32 %v1564_v3, 0.0  ;;  %v1532_v7 = vadd.f32 %v1468_v2, %v1404_v5  ;;  %1338 = vst.msk [vmem:[#allocation2 + $0xe8] sm:$0xff] %vm18_vm14, %v1273_v4  ;;  %v1029_v12 = vpop.f32.mrf.mxu2 }
 0x1eb   :  { %v1238_v9 = vpop.f32.mrf.mxu3 }
 0x1ec   :  { %1692 = vst.msk [vmem:[%s3214_s3 + $0x1e0] sm:$0xff] %vm18_vm14, %v1628_v6  ;;  %v1596_v10 = vmax.f32 %v1532_v7, 0.0  ;;  %v1239_v11 = vadd.f32 %v1238_v9, %v1029_v12  ;;  %v933_v16 = vpop.f32.mrf.mxu0 }
 0x1ed   :  { %v1142_v15 = vpop.f32.mrf.mxu1 }
 0x1ee   :  { %1660 = vst.msk [vmem:[%s3214_s3 + $0xe0] sm:$0xff] %vm18_vm14, %v1596_v10  ;;  %v1306_v17 = vadd.f32 %v1239_v11, %v792_v8  ;;  %v1143_v18 = vadd.f32 %v1142_v15, %v933_v16 }
 0x1ef   :  { %v1437_v19 = vld [vmem:[#allocation2 + $0x1e8] sm:$0xff] }
 0x1f0   :  { %v1565_v21 = vadd.f32 %v1501_v13, %v1437_v19  ;;  %1371 = vst.msk [vmem:[#allocation2 + $0x1f0] sm:$0xff] %vm18_vm14, %v1306_v17  ;;  %v1274_v22 = vadd.f32 %v1143_v18, %v760_v14 }
 0x1f1   :  { %v1405_v23 = vld [vmem:[#allocation2 + $0xe8] sm:$0xff] }
 0x1f2   :  { %v1629_v24 = vmax.f32 %v1565_v21, 0.0  ;;  %v1533_v25 = vadd.f32 %v1469_v20, %v1405_v23  ;;  %1339 = vst.msk [vmem:[#allocation2 + $0xf0] sm:$0xff] %vm18_vm14, %v1274_v22  ;;  %v1032_v26 = vpop.f32.mrf.mxu2 }
 0x1f3   :  { %v1241_v28 = vpop.f32.mrf.mxu3 }
 0x1f4   :  { %1693 = vst.msk [vmem:[%s3214_s3 + $0x1e8] sm:$0xff] %vm18_vm14, %v1629_v24  ;;  %v1597_v29 = vmax.f32 %v1533_v25, 0.0  ;;  %v1242_v30 = vadd.f32 %v1241_v28, %v1032_v26  ;;  %v936_v31 = vpop.f32.mrf.mxu0 }
 0x1f5   :  { %v1145_v34 = vpop.f32.mrf.mxu1 }
 0x1f6   :  { %1661 = vst.msk [vmem:[%s3214_s3 + $0xe8] sm:$0xff] %vm18_vm14, %v1597_v29  ;;  %v1307_v35 = vadd.f32 %v1242_v30, %v793_v27  ;;  %v1146_v36 = vadd.f32 %v1145_v34, %v936_v31 }
 0x1f7   :  { %v1438_v37 = vld [vmem:[#allocation2 + $0x1f0] sm:$0xff] }
 0x1f8   :  { %v1566_v39 = vadd.f32 %v1502_v32, %v1438_v37  ;;  %1372 = vst.msk [vmem:[#allocation2 + $0x1f8] sm:$0xff] %vm18_vm14, %v1307_v35  ;;  %v1275_v40 = vadd.f32 %v1146_v36, %v761_v33 }
 0x1f9   :  { %v1406_v41 = vld [vmem:[#allocation2 + $0xf0] sm:$0xff] }
 0x1fa   :  { %v1630_v42 = vmax.f32 %v1566_v39, 0.0  ;;  %v1534_v43 = vadd.f32 %v1470_v38, %v1406_v41  ;;  %1340 = vst.msk [vmem:[#allocation2 + $0xf8] sm:$0xff] %vm18_vm14, %v1275_v40 }
 0x1fc   :  { %1694 = vst.msk [vmem:[%s3214_s3 + $0x1f0] sm:$0xff] %vm18_vm14, %v1630_v42  ;;  %v1598_v44 = vmax.f32 %v1534_v43, 0.0 }
 0x1fe   :  { %1662 = vst.msk [vmem:[%s3214_s3 + $0xf0] sm:$0xff] %vm18_vm14, %v1598_v44 }
 0x1ff   :  { %v1439_v46 = vld [vmem:[#allocation2 + $0x1f8] sm:$0xff] }
 0x200   :  { %v1567_v48 = vadd.f32 %v1503_v45, %v1439_v46 }
 0x201   :  { %v1407_v49 = vld [vmem:[#allocation2 + $0xf8] sm:$0xff] }
 0x202   :  { %v1631_v50 = vmax.f32 %v1567_v48, 0.0  ;;  %v1535_v51 = vadd.f32 %v1471_v47, %v1407_v49 }
 0x204   :  { %1695 = vst.msk [vmem:[%s3214_s3 + $0x1f8] sm:$0xff] %vm18_vm14, %v1631_v50  ;;  %v1599_v52 = vmax.f32 %v1535_v51, 0.0 }
 0x206   :  { %1663 = vst.msk [vmem:[%s3214_s3 + $0xf8] sm:$0xff] %vm18_vm14, %v1599_v52 }

</bundles_post_ra>
